<compile_context>
chip_gen: v5e
topology: v5e:2x2
jax: 0.10.0
libtpu: 0.0.40
codegen_flags: <defaults>
</compile_context>

<pallas_src>
import functools

import jax
import jax.numpy as jnp
from jax.experimental import pallas as pl
from jax.experimental.pallas import tpu as pltpu

LANE = 128
TILE_B = 128


def dueling_qnet_kernel(x_ref, w1_ref, b1_ref,
                        wv1_ref, bv1_ref, wv2_ref, bv2_ref,
                        wa1_ref, ba1_ref, wa2_ref, ba2_ref,
                        o_ref, *, d_out):
    f32 = jnp.float32
    # Shared trunk: h = relu(x @ W1 + b1). MXU in bf16, accumulate + elementwise in f32.
    h = jnp.dot(x_ref[...], w1_ref[...], preferred_element_type=f32) + b1_ref[...]
    h = jnp.maximum(h, 0.0).astype(jnp.bfloat16)

    # Value stream. Wv2 is the (256,1) value weight replicated over the padded
    # lane axis, so every output column of `val` already equals the scalar V(s).
    v = jnp.dot(h, wv1_ref[...], preferred_element_type=f32) + bv1_ref[...]
    v = jnp.maximum(v, 0.0).astype(jnp.bfloat16)
    val = jnp.dot(v, wv2_ref[...], preferred_element_type=f32) + bv2_ref[...]

    # Advantage stream. Padded columns of Wa2 / ba2 are zero, so padded adv
    # columns are exactly zero.
    a = jnp.dot(h, wa1_ref[...], preferred_element_type=f32) + ba1_ref[...]
    a = jnp.maximum(a, 0.0).astype(jnp.bfloat16)
    adv = jnp.dot(a, wa2_ref[...], preferred_element_type=f32) + ba2_ref[...]

    # True mean over the real d_out columns (padded lanes contribute exact zeros).
    adv_mean = jnp.sum(adv, axis=-1, keepdims=True) * (1.0 / d_out)

    # Lane-dense (TILE_B, 128) store; garbage in the padded columns is sliced
    # off in the wrapper.
    o_ref[...] = val + (adv - adv_mean)


def dueling_qnet_forward(x, params, *, tile_b=TILE_B):
    """Fused dueling-Q forward pass.

    x: (B, D_in) float32
    params: PyTorch-equivalent weights stored transposed, i.e. (in, out):
        w1 (D_in,256)  b1 (1,256)     -- fc1
        wv1 (256,256)  bv1 (1,256)    -- value_fc
        wv2 (256,1)    bv2 (1,1)      -- value
        wa1 (256,256)  ba1 (1,256)    -- advantage_fc
        wa2 (256,Dout) ba2 (1,Dout)   -- advantage
    """
    B, d_in = x.shape
    hidden = params["w1"].shape[1]
    d_out = params["wa2"].shape[1]
    d_out_pad = max(LANE, pl.cdiv(d_out, LANE) * LANE)

    bf16 = jnp.bfloat16
    # MXU operands in bf16; biases stay f32 (elementwise path).
    w1 = params["w1"].astype(bf16)
    wv1 = params["wv1"].astype(bf16)
    wa1 = params["wa1"].astype(bf16)
    # Value head: replicate the single output column across the padded lanes.
    wv2 = jnp.broadcast_to(params["wv2"].astype(bf16), (hidden, d_out_pad))
    bv2 = jnp.broadcast_to(params["bv2"].astype(jnp.float32), (1, d_out_pad))
    # Advantage head: zero-pad to the lane-dense width.
    wa2 = jnp.pad(params["wa2"], ((0, 0), (0, d_out_pad - d_out))).astype(bf16)
    ba2 = jnp.pad(params["ba2"], ((0, 0), (0, d_out_pad - d_out))).astype(jnp.float32)
    b1 = params["b1"].astype(jnp.float32)
    bv1 = params["bv1"].astype(jnp.float32)
    ba1 = params["ba1"].astype(jnp.float32)

    # Pad batch to a whole number of TILE_B row tiles; slice back at the end.
    b_pad = pl.cdiv(B, tile_b) * tile_b
    x_p = jnp.pad(x, ((0, b_pad - B), (0, 0))).astype(bf16)

    resident = lambda arr: pl.BlockSpec(arr.shape, lambda i: (0, 0))  # VMEM-resident across grid
    out = pl.pallas_call(
        functools.partial(dueling_qnet_kernel, d_out=d_out),
        out_shape=jax.ShapeDtypeStruct((b_pad, d_out_pad), jnp.float32),
        grid=(b_pad // tile_b,),
        in_specs=[
            pl.BlockSpec((tile_b, d_in), lambda i: (i, 0)),
            resident(w1), resident(b1),
            resident(wv1), resident(bv1),
            resident(wv2), resident(bv2),
            resident(wa1), resident(ba1),
            resident(wa2), resident(ba2),
        ],
        out_specs=pl.BlockSpec((tile_b, d_out_pad), lambda i: (i, 0)),
        compiler_params=pltpu.CompilerParams(
            dimension_semantics=("parallel",)),
    )(x_p, w1, b1, wv1, bv1, wv2, bv2, wa1, ba1, wa2, ba2)
    return out[:B, :d_out]


def init_dueling_params(key, input_dim, output_dim):
    """Deterministic init mirroring nn.Linear default: U(-1/sqrt(fan_in), 1/sqrt(fan_in))."""
    flattened = input_dim[0] * input_dim[1]
    layers = {
        "1": (flattened, 256),     # fc1
        "v1": (256, 256),          # value_fc
        "v2": (256, 1),            # value
        "a1": (256, 256),          # advantage_fc
        "a2": (256, output_dim),   # advantage
    }
    params = {}
    for name, (fan_in, fan_out) in layers.items():
        key, kw, kb = jax.random.split(key, 3)
        bound = 1.0 / float(fan_in) ** 0.5
        params[f"w{name}"] = jax.random.uniform(
            kw, (fan_in, fan_out), jnp.float32, minval=-bound, maxval=bound)
        params[f"b{name}"] = jax.random.uniform(
            kb, (1, fan_out), jnp.float32, minval=-bound, maxval=bound)
    return params


def dueling_qnet_reference(x, p, *, matmul_dtype=jnp.bfloat16):
    """Pure-JAX reference; matmul_dtype mirrors the kernel's MXU input precision."""
    def mm(a, b):
        return jnp.dot(a.astype(matmul_dtype), b.astype(matmul_dtype),
                       preferred_element_type=jnp.float32)
    h = jnp.maximum(mm(x, p["w1"]) + p["b1"], 0.0)
    v = jnp.maximum(mm(h, p["wv1"]) + p["bv1"], 0.0)
    val = mm(v, p["wv2"]) + p["bv2"]                       # (B, 1)
    a = jnp.maximum(mm(h, p["wa1"]) + p["ba1"], 0.0)
    adv = mm(a, p["wa2"]) + p["ba2"]                       # (B, d_out)
    return val + (adv - adv.mean(axis=1, keepdims=True))


if __name__ == "__main__":
    key = jax.random.PRNGKey(0)
    input_dim = (4, 8)      # flattened_input_dim = 32
    output_dim = 4
    batch = 200             # exercises batch padding (-> 256) and a 2-step batch grid

    kp, kx = jax.random.split(key)
    params = init_dueling_params(kp, input_dim, output_dim)
    x = jax.random.normal(kx, (batch, input_dim[0] * input_dim[1]), jnp.float32)

    fwd = jax.jit(dueling_qnet_forward)
    out = jax.block_until_ready(fwd(x, params))
    assert out.shape == (batch, output_dim)

    # Same-precision reference (bf16 matmul inputs, f32 accumulate): tight check.
    ref_bf16 = dueling_qnet_reference(x, params, matmul_dtype=jnp.bfloat16)
    assert jnp.allclose(out, ref_bf16, atol=1e-3, rtol=1e-3), "mismatch vs bf16 reference"

    # Full-f32 reference: generous tolerance for bf16 matmul rounding.
    ref_f32 = dueling_qnet_reference(x, params, matmul_dtype=jnp.float32)
    assert jnp.allclose(out, ref_f32, atol=3e-2, rtol=3e-2), "mismatch vs f32 reference"

    print("KERNEL_OK")
</pallas_src>

<mosaic_0001>
module attributes {stable_mosaic.version = 11 : i64} {
  func.func @dueling_qnet_kernel(%arg0: i32, %arg1: memref<128x32xbf16, #tpu.memory_space<vmem>>, %arg2: memref<32x256xbf16, #tpu.memory_space<vmem>>, %arg3: memref<1x256xf32, #tpu.memory_space<vmem>>, %arg4: memref<256x256xbf16, #tpu.memory_space<vmem>>, %arg5: memref<1x256xf32, #tpu.memory_space<vmem>>, %arg6: memref<256x128xbf16, #tpu.memory_space<vmem>>, %arg7: memref<1x128xf32, #tpu.memory_space<vmem>>, %arg8: memref<256x256xbf16, #tpu.memory_space<vmem>>, %arg9: memref<1x256xf32, #tpu.memory_space<vmem>>, %arg10: memref<256x128xbf16, #tpu.memory_space<vmem>>, %arg11: memref<1x128xf32, #tpu.memory_space<vmem>>, %arg12: memref<128x128xf32, #tpu.memory_space<vmem>>) attributes {dimension_semantics = [#tpu.dimension_semantics<parallel>], iteration_bounds = array<i64: 2>, scalar_prefetch = 0 : i64, scratch_operands = 0 : i64, tpu.core_type = #tpu.core_type<tc>, window_params = [{transform_indices = @transform_0, window_bounds = array<i64: 128, 32>}, {pipeline_mode = #tpu.pipeline_mode<synchronous>, transform_indices = @transform_1, window_bounds = array<i64: 32, 256>}, {pipeline_mode = #tpu.pipeline_mode<synchronous>, transform_indices = @transform_2, window_bounds = array<i64: 1, 256>}, {pipeline_mode = #tpu.pipeline_mode<synchronous>, transform_indices = @transform_3, window_bounds = array<i64: 256, 256>}, {pipeline_mode = #tpu.pipeline_mode<synchronous>, transform_indices = @transform_4, window_bounds = array<i64: 1, 256>}, {pipeline_mode = #tpu.pipeline_mode<synchronous>, transform_indices = @transform_5, window_bounds = array<i64: 256, 128>}, {pipeline_mode = #tpu.pipeline_mode<synchronous>, transform_indices = @transform_6, window_bounds = array<i64: 1, 128>}, {pipeline_mode = #tpu.pipeline_mode<synchronous>, transform_indices = @transform_7, window_bounds = array<i64: 256, 256>}, {pipeline_mode = #tpu.pipeline_mode<synchronous>, transform_indices = @transform_8, window_bounds = array<i64: 1, 256>}, {pipeline_mode = #tpu.pipeline_mode<synchronous>, transform_indices = @transform_9, window_bounds = array<i64: 256, 128>}, {pipeline_mode = #tpu.pipeline_mode<synchronous>, transform_indices = @transform_10, window_bounds = array<i64: 1, 128>}, {transform_indices = @transform_11, window_bounds = array<i64: 128, 128>}]} {
    %c0 = arith.constant 0 : index
    %c0_0 = arith.constant 0 : index
    %0 = vector.load %arg1[%c0, %c0_0] : memref<128x32xbf16, #tpu.memory_space<vmem>>, vector<128x32xbf16>
    %c0_1 = arith.constant 0 : index
    %c0_2 = arith.constant 0 : index
    %1 = vector.load %arg2[%c0_1, %c0_2] : memref<32x256xbf16, #tpu.memory_space<vmem>>, vector<32x256xbf16>
    %cst = arith.constant dense<0.000000e+00> : vector<128x256xf32>
    %2 = tpu.matmul %0, %1, %cst {dimension_numbers = #tpu.dot_dimension_numbers<[1], [0], [0], [1], [0, 0, 1, 1], [], []>} : vector<128x32xbf16>, vector<32x256xbf16>, vector<128x256xf32> -> vector<128x256xf32>
    %c0_3 = arith.constant 0 : index
    %c0_4 = arith.constant 0 : index
    %3 = vector.load %arg3[%c0_3, %c0_4] : memref<1x256xf32, #tpu.memory_space<vmem>>, vector<1x256xf32>
    %4 = vector.broadcast %3 : vector<1x256xf32> to vector<128x256xf32>
    %5 = arith.addf %2, %4 : vector<128x256xf32>
    %cst_5 = arith.constant 0.000000e+00 : f32
    %6 = vector.broadcast %cst_5 : f32 to vector<128x256xf32>
    %7 = arith.maximumf %5, %6 : vector<128x256xf32>
    %8 = arith.truncf %7 : vector<128x256xf32> to vector<128x256xbf16>
    %c0_6 = arith.constant 0 : index
    %c0_7 = arith.constant 0 : index
    %9 = vector.load %arg4[%c0_6, %c0_7] : memref<256x256xbf16, #tpu.memory_space<vmem>>, vector<256x256xbf16>
    %cst_8 = arith.constant dense<0.000000e+00> : vector<128x256xf32>
    %10 = tpu.matmul %8, %9, %cst_8 {dimension_numbers = #tpu.dot_dimension_numbers<[1], [0], [0], [1], [0, 0, 1, 1], [], []>} : vector<128x256xbf16>, vector<256x256xbf16>, vector<128x256xf32> -> vector<128x256xf32>
    %c0_9 = arith.constant 0 : index
    %c0_10 = arith.constant 0 : index
    %11 = vector.load %arg5[%c0_9, %c0_10] : memref<1x256xf32, #tpu.memory_space<vmem>>, vector<1x256xf32>
    %12 = vector.broadcast %11 : vector<1x256xf32> to vector<128x256xf32>
    %13 = arith.addf %10, %12 : vector<128x256xf32>
    %cst_11 = arith.constant 0.000000e+00 : f32
    %14 = vector.broadcast %cst_11 : f32 to vector<128x256xf32>
    %15 = arith.maximumf %13, %14 : vector<128x256xf32>
    %16 = arith.truncf %15 : vector<128x256xf32> to vector<128x256xbf16>
    %c0_12 = arith.constant 0 : index
    %c0_13 = arith.constant 0 : index
    %17 = vector.load %arg6[%c0_12, %c0_13] : memref<256x128xbf16, #tpu.memory_space<vmem>>, vector<256x128xbf16>
    %cst_14 = arith.constant dense<0.000000e+00> : vector<128x128xf32>
    %18 = tpu.matmul %16, %17, %cst_14 {dimension_numbers = #tpu.dot_dimension_numbers<[1], [0], [0], [1], [0, 0, 1, 1], [], []>} : vector<128x256xbf16>, vector<256x128xbf16>, vector<128x128xf32> -> vector<128x128xf32>
    %c0_15 = arith.constant 0 : index
    %c0_16 = arith.constant 0 : index
    %19 = vector.load %arg7[%c0_15, %c0_16] : memref<1x128xf32, #tpu.memory_space<vmem>>, vector<1x128xf32>
    %20 = vector.broadcast %19 : vector<1x128xf32> to vector<128x128xf32>
    %21 = arith.addf %18, %20 : vector<128x128xf32>
    %c0_17 = arith.constant 0 : index
    %c0_18 = arith.constant 0 : index
    %22 = vector.load %arg8[%c0_17, %c0_18] : memref<256x256xbf16, #tpu.memory_space<vmem>>, vector<256x256xbf16>
    %cst_19 = arith.constant dense<0.000000e+00> : vector<128x256xf32>
    %23 = tpu.matmul %8, %22, %cst_19 {dimension_numbers = #tpu.dot_dimension_numbers<[1], [0], [0], [1], [0, 0, 1, 1], [], []>} : vector<128x256xbf16>, vector<256x256xbf16>, vector<128x256xf32> -> vector<128x256xf32>
    %c0_20 = arith.constant 0 : index
    %c0_21 = arith.constant 0 : index
    %24 = vector.load %arg9[%c0_20, %c0_21] : memref<1x256xf32, #tpu.memory_space<vmem>>, vector<1x256xf32>
    %25 = vector.broadcast %24 : vector<1x256xf32> to vector<128x256xf32>
    %26 = arith.addf %23, %25 : vector<128x256xf32>
    %cst_22 = arith.constant 0.000000e+00 : f32
    %27 = vector.broadcast %cst_22 : f32 to vector<128x256xf32>
    %28 = arith.maximumf %26, %27 : vector<128x256xf32>
    %29 = arith.truncf %28 : vector<128x256xf32> to vector<128x256xbf16>
    %c0_23 = arith.constant 0 : index
    %c0_24 = arith.constant 0 : index
    %30 = vector.load %arg10[%c0_23, %c0_24] : memref<256x128xbf16, #tpu.memory_space<vmem>>, vector<256x128xbf16>
    %cst_25 = arith.constant dense<0.000000e+00> : vector<128x128xf32>
    %31 = tpu.matmul %29, %30, %cst_25 {dimension_numbers = #tpu.dot_dimension_numbers<[1], [0], [0], [1], [0, 0, 1, 1], [], []>} : vector<128x256xbf16>, vector<256x128xbf16>, vector<128x128xf32> -> vector<128x128xf32>
    %c0_26 = arith.constant 0 : index
    %c0_27 = arith.constant 0 : index
    %32 = vector.load %arg11[%c0_26, %c0_27] : memref<1x128xf32, #tpu.memory_space<vmem>>, vector<1x128xf32>
    %33 = vector.broadcast %32 : vector<1x128xf32> to vector<128x128xf32>
    %34 = arith.addf %31, %33 : vector<128x128xf32>
    %cst_28 = arith.constant dense<0.000000e+00> : vector<128xf32>
    %35 = vector.multi_reduction <add>, %34, %cst_28 [1] : vector<128x128xf32> to vector<128xf32>
    %36 = vector.shape_cast %35 : vector<128xf32> to vector<128x1xf32>
    %cst_29 = arith.constant 2.500000e-01 : f32
    %37 = vector.broadcast %cst_29 : f32 to vector<128x1xf32>
    %38 = arith.mulf %36, %37 : vector<128x1xf32>
    %39 = vector.broadcast %38 : vector<128x1xf32> to vector<128x128xf32>
    %40 = arith.subf %34, %39 : vector<128x128xf32>
    %41 = arith.addf %21, %40 : vector<128x128xf32>
    %c0_30 = arith.constant 0 : index
    %c0_31 = arith.constant 0 : index
    %42 = vector.load %arg12[%c0_30, %c0_31] : memref<128x128xf32, #tpu.memory_space<vmem>>, vector<128x128xf32>
    tpu.vector_store %arg12[%c0_30, %c0_31], %41 {strides = array<i32>} : memref<128x128xf32, #tpu.memory_space<vmem>>, vector<128x128xf32>,
    return
  }
  func.func @transform_0(%arg0: i32) -> (i32, i32) {
    %c0_i32 = arith.constant 0 : i32
    %c0_i32_0 = arith.constant 0 : i32
    return %arg0, %c0_i32 : i32, i32
  }
  func.func @transform_1(%arg0: i32) -> (i32, i32) {
    %c0_i32 = arith.constant 0 : i32
    %c0_i32_0 = arith.constant 0 : i32
    %c0_i32_1 = arith.constant 0 : i32
    return %c0_i32, %c0_i32_0 : i32, i32
  }
  func.func @transform_2(%arg0: i32) -> (i32, i32) {
    %c0_i32 = arith.constant 0 : i32
    %c0_i32_0 = arith.constant 0 : i32
    %c0_i32_1 = arith.constant 0 : i32
    return %c0_i32, %c0_i32_0 : i32, i32
  }
  func.func @transform_3(%arg0: i32) -> (i32, i32) {
    %c0_i32 = arith.constant 0 : i32
    %c0_i32_0 = arith.constant 0 : i32
    %c0_i32_1 = arith.constant 0 : i32
    return %c0_i32, %c0_i32_0 : i32, i32
  }
  func.func @transform_4(%arg0: i32) -> (i32, i32) {
    %c0_i32 = arith.constant 0 : i32
    %c0_i32_0 = arith.constant 0 : i32
    %c0_i32_1 = arith.constant 0 : i32
    return %c0_i32, %c0_i32_0 : i32, i32
  }
  func.func @transform_5(%arg0: i32) -> (i32, i32) {
    %c0_i32 = arith.constant 0 : i32
    %c0_i32_0 = arith.constant 0 : i32
    %c0_i32_1 = arith.constant 0 : i32
    return %c0_i32, %c0_i32_0 : i32, i32
  }
  func.func @transform_6(%arg0: i32) -> (i32, i32) {
    %c0_i32 = arith.constant 0 : i32
    %c0_i32_0 = arith.constant 0 : i32
    %c0_i32_1 = arith.constant 0 : i32
    return %c0_i32, %c0_i32_0 : i32, i32
  }
  func.func @transform_7(%arg0: i32) -> (i32, i32) {
    %c0_i32 = arith.constant 0 : i32
    %c0_i32_0 = arith.constant 0 : i32
    %c0_i32_1 = arith.constant 0 : i32
    return %c0_i32, %c0_i32_0 : i32, i32
  }
  func.func @transform_8(%arg0: i32) -> (i32, i32) {
    %c0_i32 = arith.constant 0 : i32
    %c0_i32_0 = arith.constant 0 : i32
    %c0_i32_1 = arith.constant 0 : i32
    return %c0_i32, %c0_i32_0 : i32, i32
  }
  func.func @transform_9(%arg0: i32) -> (i32, i32) {
    %c0_i32 = arith.constant 0 : i32
    %c0_i32_0 = arith.constant 0 : i32
    %c0_i32_1 = arith.constant 0 : i32
    return %c0_i32, %c0_i32_0 : i32, i32
  }
  func.func @transform_10(%arg0: i32) -> (i32, i32) {
    %c0_i32 = arith.constant 0 : i32
    %c0_i32_0 = arith.constant 0 : i32
    %c0_i32_1 = arith.constant 0 : i32
    return %c0_i32, %c0_i32_0 : i32, i32
  }
  func.func @transform_11(%arg0: i32) -> (i32, i32) {
    %c0_i32 = arith.constant 0 : i32
    %c0_i32_0 = arith.constant 0 : i32
    return %arg0, %c0_i32 : i32, i32
  }
}

</mosaic_0001>

<bundles_post_ra>
// kernel: dueling_qnet_forward.1
= control target key start
LH: loop header
LB: loop body
LE: loop exit
PB: predicated region body
PF: predicated region fallthrough
CT: control target
= control target key end

     0   :  { %s2801_s17 = smov 0   ;;  %s3765_s0 = inlined_call_operand.vmem [shape: bf16[256,32], index: 0, kind: input, shape index: {}]   ;;  %s3766_s1 = inlined_call_operand.vmem [shape: bf16[32,256], index: 1, kind: input, shape index: {}]   ;;  %s3767_s2 = inlined_call_operand.vmem [shape: f32[1,256], index: 2, kind: input, shape index: {}]   ;;  %s3768_s3 = inlined_call_operand.vmem [shape: bf16[256,256], index: 3, kind: input, shape index: {}]   ;;  %s3769_s4 = inlined_call_operand.vmem [shape: f32[1,256], index: 4, kind: input, shape index: {}]   ;;  %s3770_s5 = inlined_call_operand.vmem [shape: bf16[256,128], index: 5, kind: input, shape index: {}]   ;;  %s3771_s6 = inlined_call_operand.vmem [shape: f32[1,128], index: 6, kind: input, shape index: {}]   ;;  %s3772_s7 = inlined_call_operand.vmem [shape: bf16[256,256], index: 7, kind: input, shape index: {}]   ;;  %s3773_s8 = inlined_call_operand.vmem [shape: f32[1,256], index: 8, kind: input, shape index: {}]   ;;  %s3774_s9 = inlined_call_operand.vmem [shape: bf16[256,128], index: 9, kind: input, shape index: {}]   ;;  %s3775_s10 = inlined_call_operand.vmem [shape: f32[1,128], index: 10, kind: input, shape index: {}]   ;;  %s3776_s11 = inlined_call_operand.vmem [shape: f32[256,128], index: 11, kind: output, shape index: {}]  }
   0x1 LB: > { %s2144_s18 = sadd.s32 4294967295, %s2739_s17   ;;  %p2148_p0 = scmp.ge.s32.totalorder %s2739_s17, 1  ;;  %s2739_s17 = sphi %s2801_s17, %s21_s17  }
   0x2   : > { %p338_p1 = scmp.lt.s32.totalorder %s2739_s17, 3 }
   0x4   : > { %p339_p2 = pnand %p2148_p0, %p338_p1 }
   0x5   : > { %s2149_s16 = sshll.u32 (!%p339_p2), %s2144_s18, 4 }
   0x6   : > { %342 = sbr.rel (%p339_p2) target bundleno = 956 (0x3bc), region = 64  ;;  %p379_p3 = scmp.lt.s32.totalorder (!%p339_p2), %s2149_s16, 31 }
   0xb   : > { %v2195_v0 = vld [vmem:[%s3766_s1 + $0x10] sm:$0xf]  ;;  %v2614_v1 = vld [vmem:[%s3766_s1 + $0x14] sm:$0xf0]  ;;  %v2613_v2 = vld [vmem:[%s3766_s1 + $0x14] sm:$0xf] }
   0xc   : > { %v2196_v3 = vor.u32 %v2614_v1, %v2195_v0  ;;  %v2197_v4 = vld [vmem:[%s3766_s1 + $0x18] sm:$0xf0]  ;;  %v2187_v5 = vld [vmem:[%s3766_s1] sm:$0xf]  ;;  %v2612_v6 = vld [vmem:[%s3766_s1 + $0x4] sm:$0xf0] }
   0xd   : > { %v2200_v7 = vor.u32 %v2613_v2, %v2197_v4  ;;  %v2611_v8 = vld [vmem:[%s3766_s1 + $0x4] sm:$0xf]  ;;  %v2189_v9 = vld [vmem:[%s3766_s1 + $0x8] sm:$0xf0]  ;;  %v2188_v10 = vor.u32 %v2612_v6, %v2187_v5  ;;  %s3778_s16 = smov (!%p379_p3, %s2149_s16), 31  ;;  %vm477_vm0 = vcmask 261120  }
   0xe   : > { %508 = vmatpush.bf16.msra.mxu0 %v2196_v3  ;;  %2711 = vmatpush.bf16.msra.mxu2 %v2196_v3  ;;  %v2192_v11 = vor.u32 %v2611_v8, %v2189_v9  ;;  %s2150_s19 = sshll.u32 %s3778_s16, 2  ;;  %v2629_v17 = vld [vmem:[%s3768_s3 + $0x74] sm:$0xf]  ;;  %v2277_v18 = vld [vmem:[%s3768_s3 + $0x78] sm:$0xf0]  ;;  %s2152_s15 = sshll.u32 %s3778_s16, 3 }
   0xf   : > { %557 = vmatpush.bf16.msra.mxu1 %v2200_v7  ;;  %2713 = vmatpush.bf16.msra.mxu3 %v2200_v7  ;;  %s2839_s22 = scalar_lea.vmem %s3765_s0, %s2150_s19  ;;  %v2280_v19 = vor.u32 %v2629_v17, %v2277_v18  ;;  %v2339_v20 = vld [vmem:[%s3768_s3 + $0xf0] sm:$0xf]  ;;  %v2646_v21 = vld [vmem:[%s3768_s3 + $0xf4] sm:$0xf0]  ;;  %v2627_v22 = vld [vmem:[%s3768_s3 + $0x64] sm:$0xf]  ;;  %s3712_s21 = scalar_lea.vmem %s3776_s11, %s2152_s15 }
  0x10   : > { %v2603_v12 = vld [vmem:[%s2839_s22] sm:$0xff]  ;;  %v2604_v13 = vld [vmem:[%s2839_s22 + $0x8] sm:$0xff]  ;;  %v2605_v15 = vld [vmem:[%s2839_s22 + $0x10] sm:$0xff]  ;;  %v2340_v23 = vor.u32 %v2646_v21, %v2339_v20 }
  0x11   : > { %v2848_v14 = vld [vmem:[%s2839_s22 + $0x20] sm:$0xff]  ;;  %v2608_v16 = vld [vmem:[%s2839_s22 + $0x28] sm:$0xff]  ;;  %v2645_v28 = vld [vmem:[%s3768_s3 + $0xf4] sm:$0xf] }
  0x12   : > { %509 = vmatpush.bf16.msra.mxu0 %v2188_v10  ;;  %2712 = vmatpush.bf16.msra.mxu2 %v2188_v10  ;;  %v2269_v24 = vld [vmem:[%s3768_s3 + $0x68] sm:$0xf0]  ;;  %v2331_v25 = vld [vmem:[%s3768_s3 + $0xe0] sm:$0xf]  ;;  %v2644_v27 = vld [vmem:[%s3768_s3 + $0xe4] sm:$0xf0] }
  0x13   : > { %558 = vmatpush.bf16.msra.mxu1 %v2192_v11  ;;  %2714 = vmatpush.bf16.msra.mxu3 %v2192_v11  ;;  %v2272_v26 = vor.u32 %v2627_v22, %v2269_v24  ;;  %v2341_v29 = vld [vmem:[%s3768_s3 + $0xf8] sm:$0xf0]  ;;  %v2332_v30 = vor.u32 %v2644_v27, %v2331_v25  ;;  %v2625_v32 = vld [vmem:[%s3768_s3 + $0x54] sm:$0xf]  ;;  %v2275_v34 = vld [vmem:[%s3768_s3 + $0x70] sm:$0xf] }
  0x14   : > { %v2344_v31 = vor.u32 %v2645_v28, %v2341_v29  ;;  %v2261_v33 = vld [vmem:[%s3768_s3 + $0x58] sm:$0xf0]  ;;  %v2630_v35 = vld [vmem:[%s3768_s3 + $0x74] sm:$0xf0]  ;;  %v2323_v36 = vld [vmem:[%s3768_s3 + $0xd0] sm:$0xf] }
  0x15   : > { %2201 = vmatmul.msk.bf16.vlgmr.msra.gmra.mxu0 %vm477_vm0, %v2603_v12  ;;  %2206 = vmatmul.msk.bf16.vlgmr.msra.gmra.mxu2 %vm477_vm0, %v2608_v16  ;;  %v2642_v37 = vld [vmem:[%s3768_s3 + $0xd4] sm:$0xf0]  ;;  %v2276_v38 = vor.u32 %v2630_v35, %v2275_v34  ;;  %v2643_v39 = vld [vmem:[%s3768_s3 + $0xe4] sm:$0xf]  ;;  %v2333_v40 = vld [vmem:[%s3768_s3 + $0xe8] sm:$0xf0]  ;;  %v2264_v41 = vor.u32 %v2625_v32, %v2261_v33 }
  0x16   : > { %2209 = vmatmul.msk.bf16.vlgmr.msra.gmra.mxu1 %vm477_vm0, %v2603_v12  ;;  %2213 = vmatmul.msk.bf16.vlgmr.msra.gmra.mxu3 %vm477_vm0, %v2848_v14  ;;  %v2336_v42 = vor.u32 %v2643_v39, %v2333_v40  ;;  %v2267_v43 = vld [vmem:[%s3768_s3 + $0x60] sm:$0xf]  ;;  %v2628_v44 = vld [vmem:[%s3768_s3 + $0x64] sm:$0xf0]  ;;  %v2324_v45 = vor.u32 %v2642_v37, %v2323_v36  ;;  %v2623_v47 = vld [vmem:[%s3768_s3 + $0x44] sm:$0xf] }
  0x17   : > { %944 = vmatpush.bf16.msrb.mxu0 %v2280_v19  ;;  %895 = vmatpush.bf16.msrb.mxu3 %v2340_v23  ;;  %v2268_v46 = vor.u32 %v2628_v44, %v2267_v43  ;;  %v2253_v48 = vld [vmem:[%s3768_s3 + $0x48] sm:$0xf0]  ;;  %v2315_v49 = vld [vmem:[%s3768_s3 + $0xc0] sm:$0xf]  ;;  %v2641_v50 = vld [vmem:[%s3768_s3 + $0xd4] sm:$0xf] }
  0x18   : > { %993 = vmatpush.bf16.msrb.mxu1 %v2344_v31  ;;  %846 = vmatpush.bf16.msrb.mxu2 %v2276_v38  ;;  %v2325_v51 = vld [vmem:[%s3768_s3 + $0xd8] sm:$0xf0]  ;;  %v2640_v52 = vld [vmem:[%s3768_s3 + $0xc4] sm:$0xf0]  ;;  %v2259_v54 = vld [vmem:[%s3768_s3 + $0x50] sm:$0xf]  ;;  %v2256_v57 = vor.u32 %v2623_v47, %v2253_v48 }
  0x19   : > { %v2328_v53 = vor.u32 %v2641_v50, %v2325_v51  ;;  %v2626_v55 = vld [vmem:[%s3768_s3 + $0x54] sm:$0xf0]  ;;  %v2621_v58 = vld [vmem:[%s3768_s3 + $0x34] sm:$0xf]  ;;  %v2245_v59 = vld [vmem:[%s3768_s3 + $0x38] sm:$0xf0]  ;;  %v2316_v63 = vor.u32 %v2640_v52, %v2315_v49 }
  0x1a   : > { %v2606_v56 = vld [vmem:[%s2839_s22 + $0x18] sm:$0xff]  ;;  %v2639_v60 = vld [vmem:[%s3768_s3 + $0xc4] sm:$0xf]  ;;  %v2317_v61 = vld [vmem:[%s3768_s3 + $0xc8] sm:$0xf0]  ;;  %v2260_v0 = vor.u32 %v2626_v55, %v2259_v54  ;;  %v2248_v5 = vor.u32 %v2621_v58, %v2245_v59 }
  0x1b   : > { %945 = vmatpush.bf16.msrb.mxu0 %v2272_v26  ;;  %896 = vmatpush.bf16.msrb.mxu3 %v2332_v30  ;;  %v2609_v62 = vld [vmem:[%s2839_s22 + $0x30] sm:$0xff]  ;;  %v2251_v1 = vld [vmem:[%s3768_s3 + $0x40] sm:$0xf]  ;;  %v2624_v2 = vld [vmem:[%s3768_s3 + $0x44] sm:$0xf0]  ;;  %v2320_v6 = vor.u32 %v2639_v60, %v2317_v61 }
  0x1c   : > { %994 = vmatpush.bf16.msrb.mxu1 %v2336_v42  ;;  %847 = vmatpush.bf16.msrb.mxu2 %v2268_v46  ;;  %v2307_v3 = vld [vmem:[%s3768_s3 + $0xb0] sm:$0xf]  ;;  %v2638_v4 = vld [vmem:[%s3768_s3 + $0xb4] sm:$0xf0]  ;;  %v2619_v7 = vld [vmem:[%s3768_s3 + $0x24] sm:$0xf]  ;;  %v2252_v11 = vor.u32 %v2624_v2, %v2251_v1 }
  0x1d   : > { %v2237_v8 = vld [vmem:[%s3768_s3 + $0x28] sm:$0xf0]  ;;  %v2637_v9 = vld [vmem:[%s3768_s3 + $0xb4] sm:$0xf]  ;;  %v2309_v10 = vld [vmem:[%s3768_s3 + $0xb8] sm:$0xf0]  ;;  %v2308_v12 = vor.u32 %v2638_v4, %v2307_v3 }
  0x1e   : > { %v2636_v17 = vld [vmem:[%s3768_s3 + $0xa4] sm:$0xf0]  ;;  %v2240_v18 = vor.u32 %v2619_v7, %v2237_v8  ;;  %v2312_v19 = vor.u32 %v2637_v9, %v2309_v10  ;;  %v2235_v22 = vld [vmem:[%s3768_s3 + $0x20] sm:$0xf]  ;;  %v2610_v25 = vld [vmem:[%s2839_s22 + $0x38] sm:$0xff] }
  0x1f   : > { %946 = vmatpush.bf16.msrb.mxu0 %v2264_v41  ;;  %897 = vmatpush.bf16.msrb.mxu3 %v2324_v45  ;;  %v2620_v23 = vld [vmem:[%s3768_s3 + $0x24] sm:$0xf0]  ;;  %v2635_v26 = vld [vmem:[%s3768_s3 + $0xa4] sm:$0xf]  ;;  %v2301_v27 = vld [vmem:[%s3768_s3 + $0xa8] sm:$0xf0] }
  0x20   : > { %995 = vmatpush.bf16.msrb.mxu1 %v2328_v53  ;;  %848 = vmatpush.bf16.msrb.mxu2 %v2260_v0  ;;  %v2236_v24 = vor.u32 %v2620_v23, %v2235_v22  ;;  %v2304_v28 = vor.u32 %v2635_v26, %v2301_v27  ;;  %v2291_v29 = vld [vmem:[%s3768_s3 + $0x90] sm:$0xf]  ;;  %v2618_v32 = vld [vmem:[%s3768_s3 + $0x14] sm:$0xf0]  ;;  %v2617_v33 = vld [vmem:[%s3768_s3 + $0x14] sm:$0xf] }
  0x21   : > { %v2227_v30 = vld [vmem:[%s3768_s3 + $0x10] sm:$0xf]  ;;  %v2229_v34 = vld [vmem:[%s3768_s3 + $0x18] sm:$0xf0]  ;;  %v2633_v37 = vld [vmem:[%s3768_s3 + $0x94] sm:$0xf] }
  0x22   : > { %v2228_v35 = vor.u32 %v2618_v32, %v2227_v30  ;;  %v2232_v36 = vor.u32 %v2617_v33, %v2229_v34  ;;  %v2293_v38 = vld [vmem:[%s3768_s3 + $0x98] sm:$0xf0]  ;;  %v2219_v40 = vld [vmem:[%s3768_s3] sm:$0xf]  ;;  %v2616_v41 = vld [vmem:[%s3768_s3 + $0x4] sm:$0xf0] }
  0x23   : > { %947 = vmatpush.bf16.msrb.mxu0 %v2256_v57  ;;  %898 = vmatpush.bf16.msrb.mxu3 %v2316_v63  ;;  %v2296_v39 = vor.u32 %v2633_v37, %v2293_v38  ;;  %v2283_v42 = vld [vmem:[%s3768_s3 + $0x80] sm:$0xf]  ;;  %v2220_v43 = vor.u32 %v2616_v41, %v2219_v40  ;;  %v2632_v44 = vld [vmem:[%s3768_s3 + $0x84] sm:$0xf0]  ;;  %v2615_v45 = vld [vmem:[%s3768_s3 + $0x4] sm:$0xf] }
  0x24   : > { %996 = vmatpush.bf16.msrb.mxu1 %v2320_v6  ;;  %849 = vmatpush.bf16.msrb.mxu2 %v2252_v11  ;;  %v2221_v46 = vld [vmem:[%s3768_s3 + $0x8] sm:$0xf0]  ;;  %v2284_v47 = vor.u32 %v2632_v44, %v2283_v42  ;;  %v2631_v49 = vld [vmem:[%s3768_s3 + $0x84] sm:$0xf]  ;;  %v411_v52 = vld [vmem:[%s3767_s2] sm:$0x3] }
  0x25   : > { %2202 = vmatmul.msk.bf16.gmra.mxu0 %vm477_vm0, %v2604_v13  ;;  %2207 = vmatmul.msk.bf16.gmra.mxu2 %vm477_vm0, %v2609_v62  ;;  %v2224_v48 = vor.u32 %v2615_v45, %v2221_v46  ;;  %v2285_v50 = vld [vmem:[%s3768_s3 + $0x88] sm:$0xf0]  ;;  %v3064_v55 = vperm.slane %v411_v52, 0  ;;  %v2654_v57 = vld [vmem:[%s3770_s5 + $0x38] sm:$0xff]  ;;  %v2653_v9 = vld [vmem:[%s3770_s5 + $0x30] sm:$0xff] }
  0x26   : > { %2210 = vmatmul.msk.bf16.gmra.mxu1 %vm477_vm0, %v2604_v13  ;;  %2214 = vmatmul.msk.bf16.gmra.mxu3 %vm477_vm0, %v2608_v16  ;;  %v2243_v13 = vld [vmem:[%s3768_s3 + $0x30] sm:$0xf]  ;;  %v2299_v16 = vld [vmem:[%s3768_s3 + $0xa0] sm:$0xf]  ;;  %v2288_v51 = vor.u32 %v2631_v49, %v2285_v50  ;;  %v2662_v58 = vld [vmem:[%s3770_s5 + $0x78] sm:$0xff] }
  0x27   : > { %948 = vmatpush.bf16.msrb.mxu0 %v2248_v5  ;;  %899 = vmatpush.bf16.msrb.mxu3 %v2308_v12  ;;  %v2300_v21 = vor.u32 %v2636_v17, %v2299_v16  ;;  %v2661_v10 = vld [vmem:[%s3770_s5 + $0x70] sm:$0xff]  ;;  %v2652_v26 = vld [vmem:[%s3770_s5 + $0x28] sm:$0xff]  ;;  %v2651_v42 = vld [vmem:[%s3770_s5 + $0x20] sm:$0xff] }
  0x28   : > { %997 = vmatpush.bf16.msrb.mxu1 %v2312_v19  ;;  %v2660_v27 = vld [vmem:[%s3770_s5 + $0x68] sm:$0xff] }
  0x2b   : > { %949 = vmatpush.bf16.msrb.mxu0 %v2240_v18  ;;  %900 = vmatpush.bf16.msrb.mxu3 %v2300_v21 }
  0x2c   : > { %998 = vmatpush.bf16.msrb.mxu1 %v2304_v28 }
  0x2f   : > { %950 = vmatpush.bf16.msrb.mxu0 %v2232_v36 }
  0x30   : > { %999 = vmatpush.bf16.msrb.mxu1 %v2296_v39 }
  0x33   : > { %951 = vmatpush.bf16.msrb.mxu0 %v2224_v48 }
  0x34   : > { %1000 = vmatpush.bf16.msrb.mxu1 %v2288_v51 }
  0x35   : > { %2203 = vmatmul.msk.bf16.gmra.mxu0 %vm477_vm0, %v2605_v15  ;;  %2208 = vmatmul.msk.bf16.gmra.mxu2 %vm477_vm0, %v2610_v25 }
  0x36   : > { %2211 = vmatmul.msk.bf16.gmra.mxu1 %vm477_vm0, %v2605_v15  ;;  %2215 = vmatmul.msk.bf16.gmra.mxu3 %vm477_vm0, %v2609_v62  ;;  %v2622_v15 = vld [vmem:[%s3768_s3 + $0x34] sm:$0xf0] }
  0x37   : > { %v2244_v20 = vor.u32 %v2622_v15, %v2243_v13 }
  0x39   : > { %850 = vmatpush.bf16.msrb.mxu2 %v2244_v20 }
  0x3d   : > { %851 = vmatpush.bf16.msrb.mxu2 %v2236_v24 }
  0x41   : > { %852 = vmatpush.bf16.msrb.mxu2 %v2228_v35 }
  0x45   : > { %2204 = vmatmul.msk.bf16.gmra.mxu0 %vm477_vm0, %v2606_v56  ;;  %853 = vmatpush.bf16.msrb.mxu2 %v2220_v43  ;;  %v2659_v43 = vld [vmem:[%s3770_s5 + $0x60] sm:$0xff] }
  0x46   : > { %2212 = vmatmul.msk.bf16.gmra.mxu1 %vm477_vm0, %v2606_v56  ;;  %2216 = vmatmul.msk.bf16.gmra.mxu3 %vm477_vm0, %v2610_v25  ;;  %v3066_v56 = vperm.slane %v411_v52, 1 }
  0x49   : > { %1222 = vmatpush.bf16.msra.mxu2 %v2654_v57 }
  0x4d   : > { %1223 = vmatpush.bf16.msra.mxu2 %v2653_v9 }
  0x51   : > { %1224 = vmatpush.bf16.msra.mxu2 %v2652_v26  ;;  %v2676_v26 = vld [vmem:[%s3772_s7 + $0x64] sm:$0xf0] }
  0x55   : > { %2205 = vmatmul.msk.bf16.gmra.mxu0 %vm477_vm0, %v2848_v14  ;;  %v2634_v14 = vld [vmem:[%s3768_s3 + $0x94] sm:$0xf0]  ;;  %1225 = vmatpush.bf16.msra.mxu2 %v2651_v42 }
  0x56   : > { %v2292_v31 = vor.u32 %v2634_v14, %v2291_v29 }
  0x58   : > { %901 = vmatpush.bf16.msrb.mxu3 %v2292_v31 }
  0x5c   : > { %902 = vmatpush.bf16.msrb.mxu3 %v2284_v47 }
  0x60   : > { %1271 = vmatpush.bf16.msra.mxu3 %v2662_v58 }
  0x64   : > { %1272 = vmatpush.bf16.msra.mxu3 %v2661_v10 }
  0x68   : > { %1273 = vmatpush.bf16.msra.mxu3 %v2660_v27 }
  0x6c   : > { %1274 = vmatpush.bf16.msra.mxu3 %v2659_v43 }
  0x92   : > { %v511_v53 = vpop.f32.mrf.mxu0 }
  0x93   : > { %v560_v54 = vpop.f32.mrf.mxu1  ;;  %v512_v59 = vadd.f32 %v511_v53, %v3064_v55 }
  0x94   : > { %v561_v60 = vadd.f32 %v560_v54, %v3066_v56 }
  0x95   : > { %v600_v1 = vmax.f32 %v512_v59, 0.0 }
  0x96   : > { %v601_v2 = vmax.f32 %v561_v60, 0.0 }
  0x98   : > { %v536_v59 = vpop.f32.mrf.mxu2 }
  0x99   : > { %v580_v37 = vpop.f32.mrf.mxu3 }
  0x9a   : > { %v513_v61 = vpop.f32.mrf.mxu0 }
  0x9b   : > { %v562_v62 = vpop.f32.mrf.mxu1  ;;  %v514_v63 = vadd.f32 %v513_v61, %v3064_v55 }
  0x9c   : > { %v563_v0 = vadd.f32 %v562_v62, %v3066_v56  ;;  %v2650_v62 = vld [vmem:[%s3770_s5 + $0x18] sm:$0xff] }
  0x9d   : > { %v602_v3 = vmax.f32 %v514_v63, 0.0  ;;  %v2658_v63 = vld [vmem:[%s3770_s5 + $0x58] sm:$0xff]  ;;  %1226 = vmatpush.bf16.msra.mxu2 %v2650_v62 }
  0x9e   : > { %v603_v4 = vmax.f32 %v563_v0, 0.0  ;;  %1275 = vmatpush.bf16.msra.mxu3 %v2658_v63  ;;  %v581_v0 = vadd.f32 %v580_v37, %v3066_v56  ;;  %v2435_v63 = vld [vmem:[%s3772_s7 + $0x30] sm:$0xf] }
  0x9f   : > { %v3078_v5 = vpack.c.bf16 %v602_v3, %v600_v1 }
  0xa0   : > { %v3080_v6 = vpack.c.bf16 %v603_v4, %v601_v2  ;;  %v617_v4 = vmax.f32 %v581_v0, 0.0  ;;  %v538_v9 = vpop.f32.mrf.mxu2  ;;  %v2670_v0 = vld [vmem:[%s3772_s7 + $0x34] sm:$0xf0] }
  0xa1   : > { %854 = vmatmul.bf16.vlgmr.msrb.gmra.mxu2 %v3078_v5  ;;  %952 = vmatmul.bf16.vlgmr.msrb.gmra.mxu0 %v3078_v5  ;;  %v582_v44 = vpop.f32.mrf.mxu3 }
  0xa2   : > { %903 = vmatmul.bf16.vlgmr.msrb.gmra.mxu3 %v3080_v6  ;;  %1001 = vmatmul.bf16.vlgmr.msrb.gmra.mxu1 %v3080_v6  ;;  %v516_v7 = vpop.f32.mrf.mxu0  ;;  %v583_v1 = vadd.f32 %v582_v44, %v3066_v56 }
  0xa3   : > { %v565_v8 = vpop.f32.mrf.mxu1  ;;  %v517_v11 = vadd.f32 %v516_v7, %v3064_v55 }
  0xa4   : > { %v566_v12 = vadd.f32 %v565_v8, %v3066_v56  ;;  %v619_v7 = vmax.f32 %v583_v1, 0.0  ;;  %v2499_v1 = vld [vmem:[%s3772_s7 + $0xb0] sm:$0xf] }
  0xa5   : > { %v604_v18 = vmax.f32 %v517_v11, 0.0 }
  0xa6   : > { %v605_v19 = vmax.f32 %v566_v12, 0.0 }
  0xa9   : > { %v585_v61 = vpop.f32.mrf.mxu3 }
  0xaa   : > { %v518_v13 = vpop.f32.mrf.mxu0 }
  0xab   : > { %v567_v15 = vpop.f32.mrf.mxu1  ;;  %v519_v16 = vadd.f32 %v518_v13, %v3064_v55  ;;  %v3150_v13 = vpack.c.bf16 %v619_v7, %v617_v4  ;;  %v2648_v7 = vld [vmem:[%s3770_s5 + $0x8] sm:$0xff] }
  0xac   : > { %v568_v17 = vadd.f32 %v567_v15, %v3066_v56 }
  0xad   : > { %v606_v20 = vmax.f32 %v519_v16, 0.0  ;;  %v2467_v16 = vld [vmem:[%s3772_s7 + $0x70] sm:$0xf] }
  0xae   : > { %v607_v21 = vmax.f32 %v568_v17, 0.0  ;;  %v2678_v17 = vld [vmem:[%s3772_s7 + $0x74] sm:$0xf0] }
  0xaf   : > { %v3096_v22 = vpack.c.bf16 %v606_v20, %v604_v18  ;;  %v2468_v18 = vor.u32 %v2678_v17, %v2467_v16  ;;  %v2694_v20 = vld [vmem:[%s3772_s7 + $0xf4] sm:$0xf0]  ;;  %v2656_v16 = vld [vmem:[%s3770_s5 + $0x48] sm:$0xff] }
  0xb0   : > { %v3098_v23 = vpack.c.bf16 %v607_v21, %v605_v19  ;;  %v2531_v19 = vld [vmem:[%s3772_s7 + $0xf0] sm:$0xf] }
  0xb1   : > { %859 = vmatmul.bf16.gmra.mxu2 %v3096_v22  ;;  %957 = vmatmul.bf16.gmra.mxu0 %v3096_v22  ;;  %v587_v10 = vpop.f32.mrf.mxu3  ;;  %v2532_v21 = vor.u32 %v2694_v20, %v2531_v19  ;;  %v2666_v19 = vld [vmem:[%s3772_s7 + $0x14] sm:$0xf0]  ;;  %v2483_v20 = vld [vmem:[%s3772_s7 + $0x90] sm:$0xf] }
  0xb2   : > { %908 = vmatmul.bf16.gmra.mxu3 %v3098_v23  ;;  %1006 = vmatmul.bf16.gmra.mxu1 %v3098_v23  ;;  %v521_v24 = vpop.f32.mrf.mxu0  ;;  %v588_v42 = vadd.f32 %v587_v10, %v3066_v56 }
  0xb3   : > { %v570_v25 = vpop.f32.mrf.mxu1  ;;  %v522_v28 = vadd.f32 %v521_v24, %v3064_v55  ;;  %v2649_v24 = vld [vmem:[%s3770_s5 + $0x10] sm:$0xff]  ;;  %1518 = vmatpush.bf16.msra.mxu0 %v2468_v18  ;;  %1567 = vmatpush.bf16.msra.mxu1 %v2532_v21  ;;  %v2682_v21 = vld [vmem:[%s3772_s7 + $0x94] sm:$0xf0] }
  0xb4   : > { %v571_v29 = vadd.f32 %v570_v25, %v3066_v56  ;;  %v2459_v25 = vld [vmem:[%s3772_s7 + $0x60] sm:$0xf]  ;;  %1227 = vmatpush.bf16.msra.mxu2 %v2649_v24  ;;  %v2419_v18 = vld [vmem:[%s3772_s7 + $0x10] sm:$0xf] }
  0xb5   : > { %v608_v33 = vmax.f32 %v522_v28, 0.0  ;;  %v2460_v27 = vor.u32 %v2676_v26, %v2459_v25  ;;  %v2523_v28 = vld [vmem:[%s3772_s7 + $0xe0] sm:$0xf] }
  0xb6   : > { %v609_v34 = vmax.f32 %v571_v29, 0.0  ;;  %v2692_v29 = vld [vmem:[%s3772_s7 + $0xe4] sm:$0xf0] }
  0xb7   : > { %1519 = vmatpush.bf16.msra.mxu0 %v2460_v27 }
  0xb8   : > { %1228 = vmatpush.bf16.msra.mxu2 %v2648_v7 }
  0xb9   : > { %v590_v37 = vpop.f32.mrf.mxu3 }
  0xba   : > { %v523_v14 = vpop.f32.mrf.mxu0  ;;  %v591_v25 = vadd.f32 %v590_v37, %v3066_v56  ;;  %v2475_v37 = vld [vmem:[%s3772_s7 + $0x80] sm:$0xf] }
  0xbb   : > { %v572_v30 = vpop.f32.mrf.mxu1  ;;  %v524_v31 = vadd.f32 %v523_v14, %v3064_v55  ;;  %v2657_v14 = vld [vmem:[%s3770_s5 + $0x50] sm:$0xff] }
  0xbc   : > { %v573_v32 = vadd.f32 %v572_v30, %v3066_v56  ;;  %v2524_v30 = vor.u32 %v2692_v29, %v2523_v28  ;;  %1276 = vmatpush.bf16.msra.mxu3 %v2657_v14  ;;  %v2420_v28 = vor.u32 %v2666_v19, %v2419_v18  ;;  %v2484_v29 = vor.u32 %v2682_v21, %v2483_v20 }
  0xbd   : > { %v610_v35 = vmax.f32 %v524_v31, 0.0  ;;  %v2451_v31 = vld [vmem:[%s3772_s7 + $0x50] sm:$0xf] }
  0xbe   : > { %v611_v36 = vmax.f32 %v573_v32, 0.0  ;;  %v2674_v32 = vld [vmem:[%s3772_s7 + $0x54] sm:$0xf0]  ;;  %1568 = vmatpush.bf16.msra.mxu1 %v2524_v30 }
  0xbf   : > { %v3114_v38 = vpack.c.bf16 %v610_v35, %v608_v33  ;;  %v2515_v33 = vld [vmem:[%s3772_s7 + $0xd0] sm:$0xf]  ;;  %v537_v35 = vadd.f32 %v536_v59, %v3064_v55  ;;  %v2452_v43 = vor.u32 %v2674_v32, %v2451_v31  ;;  %v625_v32 = vmax.f32 %v591_v25, 0.0  ;;  %v2675_v25 = vld [vmem:[%s3772_s7 + $0x64] sm:$0xf] }
  0xc0   : > { %v3116_v39 = vpack.c.bf16 %v611_v36, %v609_v34  ;;  %v2690_v34 = vld [vmem:[%s3772_s7 + $0xd4] sm:$0xf0]  ;;  %v541_v36 = vpop.f32.mrf.mxu2  ;;  %1277 = vmatpush.bf16.msra.mxu3 %v2656_v16 }
  0xc1   : > { %864 = vmatmul.bf16.gmra.mxu2 %v3114_v38  ;;  %962 = vmatmul.bf16.gmra.mxu0 %v3114_v38  ;;  %v2516_v44 = vor.u32 %v2690_v34, %v2515_v33  ;;  %v592_v62 = vpop.f32.mrf.mxu3  ;;  %v542_v24 = vadd.f32 %v541_v36, %v3064_v55  ;;  %v2664_v36 = vld [vmem:[%s3772_s7 + $0x4] sm:$0xf0] }
  0xc2   : > { %913 = vmatmul.bf16.gmra.mxu3 %v3116_v39  ;;  %1011 = vmatmul.bf16.gmra.mxu1 %v3116_v39  ;;  %v526_v40 = vpop.f32.mrf.mxu0  ;;  %v593_v27 = vadd.f32 %v592_v62, %v3066_v56  ;;  %v2655_v62 = vld [vmem:[%s3770_s5 + $0x40] sm:$0xff] }
  0xc3   : > { %v575_v41 = vpop.f32.mrf.mxu1  ;;  %v527_v45 = vadd.f32 %v526_v40, %v3064_v55  ;;  %v586_v40 = vadd.f32 %v585_v61, %v3066_v56  ;;  %1520 = vmatpush.bf16.msra.mxu0 %v2452_v43  ;;  %1569 = vmatpush.bf16.msra.mxu1 %v2516_v44  ;;  %v624_v31 = vmax.f32 %v542_v24, 0.0 }
  0xc4   : > { %v576_v46 = vadd.f32 %v575_v41, %v3066_v56  ;;  %v539_v41 = vadd.f32 %v538_v9, %v3064_v55  ;;  %v2668_v9 = vld [vmem:[%s3772_s7 + $0x24] sm:$0xf0]  ;;  %v627_v34 = vmax.f32 %v593_v27, 0.0  ;;  %1278 = vmatpush.bf16.msra.mxu3 %v2655_v62  ;;  %v2673_v62 = vld [vmem:[%s3772_s7 + $0x54] sm:$0xf] }
  0xc5   : > { %v612_v51 = vmax.f32 %v527_v45, 0.0  ;;  %v2443_v45 = vld [vmem:[%s3772_s7 + $0x40] sm:$0xf] }
  0xc6   : > { %v613_v52 = vmax.f32 %v576_v46, 0.0  ;;  %v2672_v46 = vld [vmem:[%s3772_s7 + $0x44] sm:$0xf0]  ;;  %v3284_v44 = vpack.c.bf16 %v627_v34, %v625_v32  ;;  %v2691_v32 = vld [vmem:[%s3772_s7 + $0xe4] sm:$0xf] }
  0xc8   : > { %v543_v61 = vpop.f32.mrf.mxu2 }
  0xc9   : > { %v544_v26 = vadd.f32 %v543_v61, %v3064_v55  ;;  %v595_v30 = vpop.f32.mrf.mxu3 }
  0xca   : > { %v528_v47 = vpop.f32.mrf.mxu0 }
  0xcb   : > { %v577_v48 = vpop.f32.mrf.mxu1  ;;  %v529_v49 = vadd.f32 %v528_v47, %v3064_v55  ;;  %v2507_v47 = vld [vmem:[%s3772_s7 + $0xc0] sm:$0xf]  ;;  %v626_v33 = vmax.f32 %v544_v26, 0.0  ;;  %v2461_v26 = vld [vmem:[%s3772_s7 + $0x68] sm:$0xf0] }
  0xcc   : > { %v578_v50 = vadd.f32 %v577_v48, %v3066_v56  ;;  %v2688_v48 = vld [vmem:[%s3772_s7 + $0xc4] sm:$0xf0] }
  0xcd   : > { %v614_v53 = vmax.f32 %v529_v49, 0.0  ;;  %v620_v49 = vmax.f32 %v537_v35, 0.0  ;;  %v2411_v35 = vld [vmem:[%s3772_s7] sm:$0xf]  ;;  %v3282_v43 = vpack.c.bf16 %v626_v33, %v624_v31  ;;  %v2525_v33 = vld [vmem:[%s3772_s7 + $0xe8] sm:$0xf0] }
  0xce   : > { %v615_v54 = vmax.f32 %v578_v50, 0.0  ;;  %v621_v50 = vmax.f32 %v586_v40, 0.0  ;;  %v2412_v40 = vor.u32 %v2664_v36, %v2411_v35  ;;  %v2528_v36 = vor.u32 %v2691_v32, %v2525_v33 }
  0xcf   : > { %v3132_v57 = vpack.c.bf16 %v614_v53, %v612_v51  ;;  %v622_v51 = vmax.f32 %v539_v41, 0.0  ;;  %v2444_v53 = vor.u32 %v2672_v46, %v2443_v45  ;;  %v2680_v41 = vld [vmem:[%s3772_s7 + $0x84] sm:$0xf0] }
  0xd0   : > { %v3134_v58 = vpack.c.bf16 %v615_v54, %v613_v52  ;;  %v623_v52 = vmax.f32 %v588_v42, 0.0  ;;  %v2508_v54 = vor.u32 %v2688_v48, %v2507_v47  ;;  %v546_v14 = vpop.f32.mrf.mxu2  ;;  %v2476_v42 = vor.u32 %v2680_v41, %v2475_v37 }
  0xd1   : > { %869 = vmatmul.bf16.gmra.mxu2 %v3132_v57  ;;  %967 = vmatmul.bf16.gmra.mxu0 %v3132_v57  ;;  %v3216_v59 = vpack.c.bf16 %v622_v51, %v620_v49  ;;  %v597_v46 = vpop.f32.mrf.mxu3  ;;  %v547_v47 = vadd.f32 %v546_v14, %v3064_v55  ;;  %v596_v48 = vadd.f32 %v595_v30, %v3066_v56  ;;  %v2647_v51 = vld [vmem:[%s3770_s5] sm:$0xff] }
  0xd2   : > { %918 = vmatmul.bf16.gmra.mxu3 %v3134_v58  ;;  %1016 = vmatmul.bf16.gmra.mxu1 %v3134_v58  ;;  %v531_v60 = vpop.f32.mrf.mxu0 }
  0xd3   : > { %v532_v2 = vadd.f32 %v531_v60, %v3064_v55  ;;  %v3218_v60 = vpack.c.bf16 %v623_v52, %v621_v50  ;;  %1521 = vmatpush.bf16.msra.mxu0 %v2444_v53  ;;  %1570 = vmatpush.bf16.msra.mxu1 %v2508_v54  ;;  %v598_v50 = vadd.f32 %v597_v46, %v3066_v56  ;;  %v628_v52 = vmax.f32 %v547_v47, 0.0  ;;  %v2469_v56 = vld [vmem:[%s3772_s7 + $0x78] sm:$0xf0] }
  0xd4   : > { %v629_v53 = vmax.f32 %v596_v48, 0.0  ;;  %1229 = vmatpush.bf16.msra.mxu2 %v2647_v51 }
  0xd5   : > { %v616_v11 = vmax.f32 %v532_v2, 0.0  ;;  %v2436_v2 = vor.u32 %v2670_v0, %v2435_v63  ;;  %v631_v61 = vmax.f32 %v598_v50, 0.0 }
  0xd7   : > { %1522 = vmatpush.bf16.msra.mxu0 %v2436_v2  ;;  %v3302_v0 = vpack.c.bf16 %v631_v61, %v629_v53  ;;  %v2693_v2 = vld [vmem:[%s3772_s7 + $0xf4] sm:$0xf] }
  0xd8   : > { %v548_v45 = vpop.f32.mrf.mxu2 }
  0xd9   : > { %v549_v49 = vadd.f32 %v548_v45, %v3064_v55 }
  0xda   : > { %v533_v3 = vpop.f32.mrf.mxu0 }
  0xdb   : > { %v534_v8 = vadd.f32 %v533_v3, %v3064_v55  ;;  %v2686_v3 = vld [vmem:[%s3772_s7 + $0xb4] sm:$0xf0]  ;;  %v630_v54 = vmax.f32 %v549_v49, 0.0  ;;  %v2677_v55 = vld [vmem:[%s3772_s7 + $0x74] sm:$0xf] }
  0xdc   : > { %v2500_v4 = vor.u32 %v2686_v3, %v2499_v1  ;;  %v2472_v1 = vor.u32 %v2677_v55, %v2469_v56  ;;  %v2533_v3 = vld [vmem:[%s3772_s7 + $0xf8] sm:$0xf0] }
  0xdd   : > { %v618_v12 = vmax.f32 %v534_v8, 0.0  ;;  %v2427_v8 = vld [vmem:[%s3772_s7 + $0x20] sm:$0xf]  ;;  %v3300_v63 = vpack.c.bf16 %v630_v54, %v628_v52  ;;  %v2536_v7 = vor.u32 %v2693_v2, %v2533_v3  ;;  %v2453_v55 = vld [vmem:[%s3772_s7 + $0x58] sm:$0xf0] }
  0xde   : > { %v2428_v10 = vor.u32 %v2668_v9, %v2427_v8  ;;  %1571 = vmatpush.bf16.msra.mxu1 %v2500_v4  ;;  %1616 = vmatpush.bf16.msrb.mxu2 %v2472_v1  ;;  %v680_v4 = vld [vmem:[%s3769_s4] sm:$0x3]  ;;  %v2456_v1 = vor.u32 %v2673_v62, %v2453_v55 }
  0xdf   : > { %v3152_v15 = vpack.c.bf16 %v618_v12, %v616_v11  ;;  %v2491_v11 = vld [vmem:[%s3772_s7 + $0xa0] sm:$0xf]  ;;  %v2684_v12 = vld [vmem:[%s3772_s7 + $0xa4] sm:$0xf0]  ;;  %1665 = vmatpush.bf16.msrb.mxu3 %v2536_v7 }
  0xe0   : > { %v2492_v17 = vor.u32 %v2684_v12, %v2491_v11  ;;  %1523 = vmatpush.bf16.msra.mxu0 %v2428_v10  ;;  %v3323_v10 = vperm.slane %v680_v4, 1 }
  0xe1   : > { %874 = vmatmul.bf16.gmra.mxu2 %v3152_v15  ;;  %972 = vmatmul.bf16.gmra.mxu0 %v3152_v15 }
  0xe2   : > { %923 = vmatmul.bf16.gmra.mxu3 %v3150_v13  ;;  %1021 = vmatmul.bf16.gmra.mxu1 %v3150_v13 }
  0xe3   : > { %1572 = vmatpush.bf16.msra.mxu1 %v2492_v17  ;;  %v3328_v17 = vperm.slane %v680_v4, 0  ;;  %1666 = vmatpush.bf16.msrb.mxu3 %v2528_v36 }
  0xe4   : > { %1524 = vmatpush.bf16.msra.mxu0 %v2420_v28  ;;  %v2464_v28 = vor.u32 %v2675_v25, %v2461_v26 }
  0xe6   : > { %1617 = vmatpush.bf16.msrb.mxu2 %v2464_v28 }
  0xe7   : > { %1573 = vmatpush.bf16.msra.mxu1 %v2484_v29 }
  0xe8   : > { %1525 = vmatpush.bf16.msra.mxu0 %v2412_v40 }
  0xea   : > { %1618 = vmatpush.bf16.msrb.mxu2 %v2456_v1 }
  0xeb   : > { %1574 = vmatpush.bf16.msra.mxu1 %v2476_v42 }
  0xf1   : > { %879 = vmatmul.bf16.gmra.mxu2 %v3216_v59  ;;  %977 = vmatmul.bf16.gmra.mxu0 %v3216_v59 }
  0xf2   : > { %928 = vmatmul.bf16.gmra.mxu3 %v3218_v60  ;;  %1026 = vmatmul.bf16.gmra.mxu1 %v3218_v60 }
 0x101   : > { %884 = vmatmul.bf16.gmra.mxu2 %v3282_v43  ;;  %982 = vmatmul.bf16.gmra.mxu0 %v3282_v43 }
 0x102   : > { %933 = vmatmul.bf16.gmra.mxu3 %v3284_v44  ;;  %1031 = vmatmul.bf16.gmra.mxu1 %v3284_v44 }
 0x111   : > { %889 = vmatmul.bf16.gmra.mxu2 %v3300_v63  ;;  %987 = vmatmul.bf16.gmra.mxu0 %v3300_v63 }
 0x112   : > { %938 = vmatmul.bf16.gmra.mxu3 %v3302_v0  ;;  %1036 = vmatmul.bf16.gmra.mxu1 %v3302_v0 }
 0x11e   : > { %v953_v8 = vpop.f32.mrf.mxu0 }
 0x11f   : > { %v1002_v9 = vpop.f32.mrf.mxu1  ;;  %v954_v11 = vadd.f32 %v953_v8, %v3323_v10  ;;  %v2689_v8 = vld [vmem:[%s3772_s7 + $0xd4] sm:$0xf] }
 0x121   : > { %1526 = vmatmul.bf16.vlgmr.msra.gmra.mxu0 %v3078_v5  ;;  %v1003_v20 = vadd.f32 %v1002_v9, %v954_v11  ;;  %v2517_v9 = vld [vmem:[%s3772_s7 + $0xd8] sm:$0xf0] }
 0x122   : > { %1575 = vmatmul.bf16.vlgmr.msra.gmra.mxu1 %v3080_v6 }
 0x123   : > { %v1043_v29 = vmax.f32 %v1003_v20, 0.0 }
 0x124   : > { %v855_v12 = vpop.f32.mrf.mxu2 }
 0x125   : > { %v904_v16 = vpop.f32.mrf.mxu3  ;;  %v856_v24 = vadd.f32 %v855_v12, %v3328_v17 }
 0x126   : > { %v955_v18 = vpop.f32.mrf.mxu0 }
 0x127   : > { %v1004_v19 = vpop.f32.mrf.mxu1  ;;  %v956_v21 = vadd.f32 %v955_v18, %v3323_v10  ;;  %v905_v34 = vadd.f32 %v904_v16, %v856_v24  ;;  %v2520_v16 = vor.u32 %v2689_v8, %v2517_v9 }
 0x129   : > { %v1005_v27 = vadd.f32 %v1004_v19, %v956_v21  ;;  %v1042_v45 = vmax.f32 %v905_v34, 0.0  ;;  %1667 = vmatpush.bf16.msrb.mxu3 %v2520_v16  ;;  %v2671_v34 = vld [vmem:[%s3772_s7 + $0x44] sm:$0xf] }
 0x12b   : > { %v1045_v14 = vmax.f32 %v1005_v27, 0.0 }
 0x12c   : > { %v857_v30 = vpop.f32.mrf.mxu2 }
 0x12d   : > { %v906_v31 = vpop.f32.mrf.mxu3  ;;  %v858_v35 = vadd.f32 %v857_v30, %v3328_v17  ;;  %v1075_v37 = vpack.c.bf16 %v1045_v14, %v1043_v29 }
 0x12e   : > { %v958_v41 = vpop.f32.mrf.mxu0 }
 0x12f   : > { %v907_v40 = vadd.f32 %v906_v31, %v858_v35  ;;  %v1007_v42 = vpop.f32.mrf.mxu1  ;;  %1279 = vmatmul.bf16.vlgmr.msra.gmra.mxu3 %v1075_v37  ;;  %v959_v48 = vadd.f32 %v958_v41, %v3323_v10  ;;  %v2445_v35 = vld [vmem:[%s3772_s7 + $0x48] sm:$0xf0] }
 0x130   : > { %v2448_v37 = vor.u32 %v2671_v34, %v2445_v35 }
 0x131   : > { %v1044_v46 = vmax.f32 %v907_v40, 0.0  ;;  %1531 = vmatmul.bf16.gmra.mxu0 %v3096_v22  ;;  %v1008_v53 = vadd.f32 %v1007_v42, %v959_v48 }
 0x132   : > { %1580 = vmatmul.bf16.gmra.mxu1 %v3098_v23  ;;  %1619 = vmatpush.bf16.msrb.mxu2 %v2448_v37 }
 0x133   : > { %v1074_v47 = vpack.c.bf16 %v1044_v46, %v1042_v45  ;;  %v1047_v2 = vmax.f32 %v1008_v53, 0.0  ;;  %v2687_v46 = vld [vmem:[%s3772_s7 + $0xc4] sm:$0xf] }
 0x134   : > { %v860_v49 = vpop.f32.mrf.mxu2 }
 0x135   : > { %v909_v50 = vpop.f32.mrf.mxu3  ;;  %1230 = vmatmul.bf16.vlgmr.msra.gmra.mxu2 %v1074_v47  ;;  %v861_v61 = vadd.f32 %v860_v49, %v3328_v17  ;;  %v2509_v47 = vld [vmem:[%s3772_s7 + $0xc8] sm:$0xf0] }
 0x136   : > { %v960_v51 = vpop.f32.mrf.mxu0 }
 0x137   : > { %v1009_v52 = vpop.f32.mrf.mxu1  ;;  %v961_v54 = vadd.f32 %v960_v51, %v3323_v10  ;;  %v910_v11 = vadd.f32 %v909_v50, %v861_v61  ;;  %v2512_v50 = vor.u32 %v2687_v46, %v2509_v47 }
 0x139   : > { %v1010_v56 = vadd.f32 %v1009_v52, %v961_v54  ;;  %v1046_v24 = vmax.f32 %v910_v11, 0.0  ;;  %1668 = vmatpush.bf16.msrb.mxu3 %v2512_v50  ;;  %v2669_v11 = vld [vmem:[%s3772_s7 + $0x34] sm:$0xf] }
 0x13b   : > { %v1049_v3 = vmax.f32 %v1010_v56, 0.0 }
 0x13c   : > { %v862_v4 = vpop.f32.mrf.mxu2 }
 0x13d   : > { %v911_v7 = vpop.f32.mrf.mxu3  ;;  %v863_v12 = vadd.f32 %v862_v4, %v3328_v17  ;;  %v1077_v18 = vpack.c.bf16 %v1049_v3, %v1047_v2 }
 0x13e   : > { %v963_v20 = vpop.f32.mrf.mxu0 }
 0x13f   : > { %v912_v19 = vadd.f32 %v911_v7, %v863_v12  ;;  %v1012_v21 = vpop.f32.mrf.mxu1  ;;  %1284 = vmatmul.bf16.gmra.mxu3 %v1077_v18  ;;  %v964_v27 = vadd.f32 %v963_v20, %v3323_v10  ;;  %v2437_v12 = vld [vmem:[%s3772_s7 + $0x38] sm:$0xf0] }
 0x140   : > { %v2440_v18 = vor.u32 %v2669_v11, %v2437_v12 }
 0x141   : > { %v1048_v25 = vmax.f32 %v912_v19, 0.0  ;;  %1536 = vmatmul.bf16.gmra.mxu0 %v3114_v38  ;;  %v1013_v31 = vadd.f32 %v1012_v21, %v964_v27 }
 0x142   : > { %1585 = vmatmul.bf16.gmra.mxu1 %v3116_v39  ;;  %1620 = vmatpush.bf16.msrb.mxu2 %v2440_v18  ;;  %v3428_v18 = vld [vmem:[%s3774_s9 + $0x30] sm:$0xff] }
 0x143   : > { %v1076_v26 = vpack.c.bf16 %v1048_v25, %v1046_v24  ;;  %v1051_v40 = vmax.f32 %v1013_v31, 0.0  ;;  %v2685_v25 = vld [vmem:[%s3772_s7 + $0xb4] sm:$0xf] }
 0x144   : > { %v865_v28 = vpop.f32.mrf.mxu2 }
 0x145   : > { %v914_v29 = vpop.f32.mrf.mxu3  ;;  %1235 = vmatmul.bf16.gmra.mxu2 %v1076_v26  ;;  %v866_v33 = vadd.f32 %v865_v28, %v3328_v17  ;;  %v2501_v26 = vld [vmem:[%s3772_s7 + $0xb8] sm:$0xf0] }
 0x146   : > { %v965_v14 = vpop.f32.mrf.mxu0 }
 0x147   : > { %v1014_v30 = vpop.f32.mrf.mxu1  ;;  %v966_v32 = vadd.f32 %v965_v14, %v3323_v10  ;;  %v915_v48 = vadd.f32 %v914_v29, %v866_v33  ;;  %v2504_v29 = vor.u32 %v2685_v25, %v2501_v26  ;;  %v3435_v26 = vld [vmem:[%s3774_s9 + $0x28] sm:$0xff] }
 0x149   : > { %v1015_v36 = vadd.f32 %v1014_v30, %v966_v32  ;;  %v1050_v61 = vmax.f32 %v915_v48, 0.0  ;;  %1669 = vmatpush.bf16.msrb.mxu3 %v2504_v29  ;;  %v2667_v48 = vld [vmem:[%s3772_s7 + $0x24] sm:$0xf] }
 0x14b   : > { %v1053_v41 = vmax.f32 %v1015_v36, 0.0 }
 0x14c   : > { %v867_v42 = vpop.f32.mrf.mxu2 }
 0x14d   : > { %v916_v45 = vpop.f32.mrf.mxu3  ;;  %v868_v49 = vadd.f32 %v867_v42, %v3328_v17  ;;  %v1079_v51 = vpack.c.bf16 %v1053_v41, %v1051_v40 }
 0x14e   : > { %v968_v53 = vpop.f32.mrf.mxu0 }
 0x14f   : > { %v917_v52 = vadd.f32 %v916_v45, %v868_v49  ;;  %v1017_v54 = vpop.f32.mrf.mxu1  ;;  %1289 = vmatmul.bf16.gmra.mxu3 %v1079_v51  ;;  %v969_v56 = vadd.f32 %v968_v53, %v3323_v10  ;;  %v2429_v49 = vld [vmem:[%s3772_s7 + $0x28] sm:$0xf0] }
 0x150   : > { %v2432_v51 = vor.u32 %v2667_v48, %v2429_v49 }
 0x151   : > { %v1052_v62 = vmax.f32 %v917_v52, 0.0  ;;  %1541 = vmatmul.bf16.gmra.mxu0 %v3132_v57  ;;  %v1018_v7 = vadd.f32 %v1017_v54, %v969_v56 }
 0x152   : > { %1590 = vmatmul.bf16.gmra.mxu1 %v3134_v58  ;;  %1621 = vmatpush.bf16.msrb.mxu2 %v2432_v51  ;;  %v2698_v51 = vld [vmem:[%s3774_s9 + $0x18] sm:$0xff] }
 0x153   : > { %v1078_v55 = vpack.c.bf16 %v1052_v62, %v1050_v61  ;;  %v1055_v19 = vmax.f32 %v1018_v7, 0.0  ;;  %v2683_v62 = vld [vmem:[%s3772_s7 + $0xa4] sm:$0xf] }
 0x154   : > { %v870_v1 = vpop.f32.mrf.mxu2 }
 0x155   : > { %v919_v2 = vpop.f32.mrf.mxu3  ;;  %1240 = vmatmul.bf16.gmra.mxu2 %v1078_v55  ;;  %v871_v9 = vadd.f32 %v870_v1, %v3328_v17  ;;  %v2493_v55 = vld [vmem:[%s3772_s7 + $0xa8] sm:$0xf0] }
 0x156   : > { %v970_v3 = vpop.f32.mrf.mxu0 }
 0x157   : > { %v1019_v4 = vpop.f32.mrf.mxu1  ;;  %v971_v8 = vadd.f32 %v970_v3, %v3323_v10  ;;  %v920_v27 = vadd.f32 %v919_v2, %v871_v9  ;;  %v2496_v2 = vor.u32 %v2683_v62, %v2493_v55  ;;  %v3420_v9 = vld [vmem:[%s3774_s9 + $0x38] sm:$0xff] }
 0x158   : > { %1894 = vmatpush.bf16.msrb.mxu0 %v3420_v9 }
 0x159   : > { %v1020_v16 = vadd.f32 %v1019_v4, %v971_v8  ;;  %v1054_v33 = vmax.f32 %v920_v27, 0.0  ;;  %1670 = vmatpush.bf16.msrb.mxu3 %v2496_v2  ;;  %v2413_v2 = vld [vmem:[%s3772_s7 + $0x8] sm:$0xf0] }
 0x15b   : > { %v1057_v20 = vmax.f32 %v1020_v16, 0.0 }
 0x15c   : > { %v872_v21 = vpop.f32.mrf.mxu2  ;;  %1895 = vmatpush.bf16.msrb.mxu0 %v3428_v18 }
 0x15d   : > { %v921_v24 = vpop.f32.mrf.mxu3  ;;  %v873_v28 = vadd.f32 %v872_v21, %v3328_v17  ;;  %v1081_v14 = vpack.c.bf16 %v1057_v20, %v1055_v19 }
 0x15e   : > { %v973_v31 = vpop.f32.mrf.mxu0 }
 0x15f   : > { %v922_v30 = vadd.f32 %v921_v24, %v873_v28  ;;  %v1022_v32 = vpop.f32.mrf.mxu1  ;;  %1294 = vmatmul.bf16.gmra.mxu3 %v1081_v14  ;;  %v974_v36 = vadd.f32 %v973_v31, %v3323_v10  ;;  %v2665_v14 = vld [vmem:[%s3772_s7 + $0x14] sm:$0xf] }
 0x160   : > { %1896 = vmatpush.bf16.msrb.mxu0 %v3435_v26 }
 0x161   : > { %v1056_v34 = vmax.f32 %v922_v30, 0.0  ;;  %1546 = vmatmul.bf16.gmra.mxu0 %v3152_v15  ;;  %v1023_v45 = vadd.f32 %v1022_v32, %v974_v36  ;;  %v2421_v30 = vld [vmem:[%s3772_s7 + $0x18] sm:$0xf0] }
 0x162   : > { %1595 = vmatmul.bf16.gmra.mxu1 %v3150_v13  ;;  %v2424_v32 = vor.u32 %v2665_v14, %v2421_v30 }
 0x163   : > { %v1080_v35 = vpack.c.bf16 %v1056_v34, %v1054_v33  ;;  %v1059_v52 = vmax.f32 %v1023_v45, 0.0  ;;  %v3449_v33 = vld [vmem:[%s3774_s9 + $0x20] sm:$0xff] }
 0x164   : > { %v875_v37 = vpop.f32.mrf.mxu2  ;;  %1622 = vmatpush.bf16.msrb.mxu2 %v2424_v32  ;;  %1897 = vmatpush.bf16.msrb.mxu0 %v3449_v33 }
 0x165   : > { %v924_v40 = vpop.f32.mrf.mxu3  ;;  %1245 = vmatmul.bf16.gmra.mxu2 %v1080_v35  ;;  %v876_v47 = vadd.f32 %v875_v37, %v3328_v17 }
 0x166   : > { %v975_v41 = vpop.f32.mrf.mxu0 }
 0x167   : > { %v1024_v42 = vpop.f32.mrf.mxu1  ;;  %v976_v46 = vadd.f32 %v975_v41, %v3323_v10  ;;  %v925_v56 = vadd.f32 %v924_v40, %v876_v47  ;;  %v2681_v40 = vld [vmem:[%s3772_s7 + $0x94] sm:$0xf]  ;;  %v2485_v41 = vld [vmem:[%s3772_s7 + $0x98] sm:$0xf0] }
 0x168   : > { %1898 = vmatpush.bf16.msrb.mxu0 %v2698_v51 }
 0x169   : > { %v1025_v50 = vadd.f32 %v1024_v42, %v976_v46  ;;  %v1058_v11 = vmax.f32 %v925_v56, 0.0  ;;  %v2488_v46 = vor.u32 %v2681_v40, %v2485_v41 }
 0x16b   : > { %v1061_v53 = vmax.f32 %v1025_v50, 0.0  ;;  %1671 = vmatpush.bf16.msrb.mxu3 %v2488_v46 }
 0x16c   : > { %v877_v54 = vpop.f32.mrf.mxu2 }
 0x16d   : > { %v926_v61 = vpop.f32.mrf.mxu3  ;;  %v878_v1 = vadd.f32 %v877_v54, %v3328_v17  ;;  %v1083_v3 = vpack.c.bf16 %v1061_v53, %v1059_v52 }
 0x16e   : > { %v978_v7 = vpop.f32.mrf.mxu0 }
 0x16f   : > { %v927_v4 = vadd.f32 %v926_v61, %v878_v1  ;;  %v1027_v8 = vpop.f32.mrf.mxu1  ;;  %1299 = vmatmul.bf16.gmra.mxu3 %v1083_v3  ;;  %v979_v19 = vadd.f32 %v978_v7, %v3323_v10  ;;  %v3467_v61 = vld [vmem:[%s3774_s9 + $0x10] sm:$0xff]  ;;  %v2663_v1 = vld [vmem:[%s3772_s7 + $0x4] sm:$0xf] }
 0x170   : > { %1899 = vmatpush.bf16.msrb.mxu0 %v3467_v61  ;;  %v2416_v3 = vor.u32 %v2663_v1, %v2413_v2 }
 0x171   : > { %v1060_v12 = vmax.f32 %v927_v4, 0.0  ;;  %1551 = vmatmul.bf16.gmra.mxu0 %v3216_v59  ;;  %v1028_v27 = vadd.f32 %v1027_v8, %v979_v19  ;;  %v2696_v8 = vld [vmem:[%s3774_s9 + $0x8] sm:$0xff] }
 0x172   : > { %1600 = vmatmul.bf16.gmra.mxu1 %v3218_v60  ;;  %1623 = vmatpush.bf16.msrb.mxu2 %v2416_v3 }
 0x173   : > { %v1082_v16 = vpack.c.bf16 %v1060_v12, %v1058_v11  ;;  %v1063_v34 = vmax.f32 %v1028_v27, 0.0 }
 0x174   : > { %v880_v20 = vpop.f32.mrf.mxu2  ;;  %1900 = vmatpush.bf16.msrb.mxu0 %v2696_v8 }
 0x175   : > { %v929_v21 = vpop.f32.mrf.mxu3  ;;  %1250 = vmatmul.bf16.gmra.mxu2 %v1082_v16  ;;  %v881_v29 = vadd.f32 %v880_v20, %v3328_v17  ;;  %v2679_v20 = vld [vmem:[%s3772_s7 + $0x84] sm:$0xf] }
 0x176   : > { %v980_v24 = vpop.f32.mrf.mxu0  ;;  %2715 = vmatpush.bf16.msra.mxu2 %v3420_v9 }
 0x177   : > { %v1029_v25 = vpop.f32.mrf.mxu1  ;;  %v981_v28 = vadd.f32 %v980_v24, %v3323_v10  ;;  %v930_v42 = vadd.f32 %v929_v21, %v881_v29  ;;  %v2477_v21 = vld [vmem:[%s3772_s7 + $0x88] sm:$0xf0] }
 0x178   : > { %v2480_v24 = vor.u32 %v2679_v20, %v2477_v21 }
 0x179   : > { %v1030_v31 = vadd.f32 %v1029_v25, %v981_v28  ;;  %v1062_v52 = vmax.f32 %v930_v42, 0.0  ;;  %v2695_v25 = vld [vmem:[%s3774_s9] sm:$0xff] }
 0x17a   : > { %1672 = vmatpush.bf16.msrb.mxu3 %v2480_v24  ;;  %1901 = vmatpush.bf16.msrb.mxu0 %v2695_v25  ;;  %v2710_v24 = vld [vmem:[%s3774_s9 + $0x78] sm:$0xff] }
 0x17b   : > { %v1065_v35 = vmax.f32 %v1030_v31, 0.0  ;;  %2716 = vmatpush.bf16.msra.mxu2 %v3428_v18  ;;  %1943 = vmatpush.bf16.msrb.mxu1 %v2710_v24 }
 0x17c   : > { %v882_v36 = vpop.f32.mrf.mxu2 }
 0x17d   : > { %v931_v37 = vpop.f32.mrf.mxu3  ;;  %v883_v45 = vadd.f32 %v882_v36, %v3328_v17  ;;  %v1085_v47 = vpack.c.bf16 %v1065_v35, %v1063_v34 }
 0x17e   : > { %v983_v49 = vpop.f32.mrf.mxu0 }
 0x17f   : > { %v932_v48 = vadd.f32 %v931_v37, %v883_v45  ;;  %v1032_v50 = vpop.f32.mrf.mxu1  ;;  %1304 = vmatmul.bf16.gmra.mxu3 %v1085_v47  ;;  %v984_v62 = vadd.f32 %v983_v49, %v3323_v10  ;;  %2717 = vmatpush.bf16.msra.mxu2 %v3435_v26 }
 0x181   : > { %v1064_v53 = vmax.f32 %v932_v48, 0.0  ;;  %1556 = vmatmul.bf16.gmra.mxu0 %v3282_v43  ;;  %v1033_v11 = vadd.f32 %v1032_v50, %v984_v62 }
 0x182   : > { %1605 = vmatmul.bf16.gmra.mxu1 %v3284_v44 }
 0x183   : > { %v1084_v54 = vpack.c.bf16 %v1064_v53, %v1062_v52  ;;  %v1067_v27 = vmax.f32 %v1033_v11, 0.0  ;;  %2718 = vmatpush.bf16.msra.mxu2 %v3449_v33 }
 0x184   : > { %v885_v55 = vpop.f32.mrf.mxu2 }
 0x185   : > { %v934_v56 = vpop.f32.mrf.mxu3  ;;  %1255 = vmatmul.bf16.gmra.mxu2 %v1084_v54  ;;  %v886_v16 = vadd.f32 %v885_v55, %v3328_v17  ;;  %v3505_v55 = vld [vmem:[%s3773_s8] sm:$0x3] }
 0x186   : > { %v985_v4 = vpop.f32.mrf.mxu0 }
 0x187   : > { %v1034_v7 = vpop.f32.mrf.mxu1  ;;  %v986_v12 = vadd.f32 %v985_v4, %v3323_v10  ;;  %v935_v30 = vadd.f32 %v934_v56, %v886_v16  ;;  %2719 = vmatpush.bf16.msra.mxu2 %v2698_v51  ;;  %v3509_v51 = vperm.slane %v3505_v55, 0 }
 0x189   : > { %v1035_v19 = vadd.f32 %v1034_v7, %v986_v12  ;;  %v1066_v36 = vmax.f32 %v935_v30, 0.0 }
 0x18b   : > { %v1069_v28 = vmax.f32 %v1035_v19, 0.0  ;;  %2720 = vmatpush.bf16.msra.mxu2 %v3467_v61 }
 0x18c   : > { %v887_v29 = vpop.f32.mrf.mxu2 }
 0x18d   : > { %v936_v14 = vpop.f32.mrf.mxu3  ;;  %v888_v9 = vadd.f32 %v887_v29, %v3328_v17  ;;  %v1087_v31 = vpack.c.bf16 %v1069_v28, %v1067_v27 }
 0x18e   : > { %v988_v34 = vpop.f32.mrf.mxu0 }
 0x18f   : > { %v937_v32 = vadd.f32 %v936_v14, %v888_v9  ;;  %v1037_v35 = vpop.f32.mrf.mxu1  ;;  %1309 = vmatmul.bf16.gmra.mxu3 %v1087_v31  ;;  %v989_v41 = vadd.f32 %v988_v34, %v3323_v10  ;;  %2721 = vmatpush.bf16.msra.mxu2 %v2696_v8  ;;  %v3522_v14 = vld [vmem:[%s3771_s6] ss:$0 sm:$0xff] }
 0x191   : > { %v1068_v37 = vmax.f32 %v937_v32, 0.0  ;;  %1561 = vmatmul.bf16.gmra.mxu0 %v3300_v63  ;;  %v1038_v47 = vadd.f32 %v1037_v35, %v989_v41 }
 0x192   : > { %1610 = vmatmul.bf16.gmra.mxu1 %v3302_v0 }
 0x193   : > { %v1086_v40 = vpack.c.bf16 %v1068_v37, %v1066_v36  ;;  %v1071_v52 = vmax.f32 %v1038_v47, 0.0  ;;  %2722 = vmatpush.bf16.msra.mxu2 %v2695_v25 }
 0x194   : > { %v890_v42 = vpop.f32.mrf.mxu2 }
 0x195   : > { %v939_v45 = vpop.f32.mrf.mxu3  ;;  %1260 = vmatmul.bf16.gmra.mxu2 %v1086_v40  ;;  %v891_v49 = vadd.f32 %v890_v42, %v3328_v17 }
 0x196   : > { %v990_v46 = vpop.f32.mrf.mxu0 }
 0x197   : > { %v1039_v18 = vpop.f32.mrf.mxu1  ;;  %v991_v48 = vadd.f32 %v990_v46, %v3323_v10  ;;  %v940_v26 = vadd.f32 %v939_v45, %v891_v49 }
 0x199   : > { %v1040_v50 = vadd.f32 %v1039_v18, %v991_v48  ;;  %v1070_v3 = vmax.f32 %v940_v26, 0.0 }
 0x19b   : > { %v1073_v53 = vmax.f32 %v1040_v50, 0.0 }
 0x19c   : > { %v892_v54 = vpop.f32.mrf.mxu2 }
 0x19d   : > { %v893_v62 = vadd.f32 %v892_v54, %v3328_v17  ;;  %v941_v56 = vpop.f32.mrf.mxu3  ;;  %v1089_v33 = vpack.c.bf16 %v1073_v53, %v1071_v52 }
 0x19e   : > { %v1527_v2 = vpop.f32.mrf.mxu0 }
 0x19f   : > { %v942_v1 = vadd.f32 %v941_v56, %v893_v62  ;;  %v1576_v10 = vpop.f32.mrf.mxu1  ;;  %1314 = vmatmul.bf16.gmra.mxu3 %v1089_v33  ;;  %v1528_v17 = vadd.f32 %v1527_v2, %v3509_v51 }
 0x1a1   : > { %v1072_v4 = vmax.f32 %v942_v1, 0.0  ;;  %v1577_v16 = vadd.f32 %v1576_v10, %v1528_v17 }
 0x1a3   : > { %v1088_v7 = vpack.c.bf16 %v1072_v4, %v1070_v3  ;;  %v1714_v21 = vmax.f32 %v1577_v16, 0.0  ;;  %v2708_v4 = vld [vmem:[%s3774_s9 + $0x68] sm:$0xff] }
 0x1a5   : > { %1265 = vmatmul.bf16.gmra.mxu2 %v1088_v7 }
 0x1a6   : > { %v1529_v11 = vpop.f32.mrf.mxu0 }
 0x1a7   : > { %v1578_v12 = vpop.f32.mrf.mxu1  ;;  %v1530_v19 = vadd.f32 %v1529_v11, %v3509_v51 }
 0x1a9   : > { %v1579_v20 = vadd.f32 %v1578_v12, %v1530_v19 }
 0x1ab   : > { %v1716_v61 = vmax.f32 %v1579_v20, 0.0 }
 0x1ad   : > { %v1746_v27 = vpack.c.bf16 %v1716_v61, %v1714_v21 }
 0x1ae   : > { %v1532_v28 = vpop.f32.mrf.mxu0 }
 0x1af   : > { %v1581_v8 = vpop.f32.mrf.mxu1  ;;  %1673 = vmatmul.bf16.vlgmr.msrb.gmra.mxu3 %v3080_v6  ;;  %1902 = vmatmul.bf16.vlgmr.msrb.gmra.mxu0 %v1746_v27  ;;  %v1533_v25 = vadd.f32 %v1532_v28, %v3509_v51 }
 0x1b1   : > { %v1582_v31 = vadd.f32 %v1581_v8, %v1533_v25 }
 0x1b2   : > { %v1280_v29 = vpop.f32.mrf.mxu3 }
 0x1b3   : > { %v1718_v40 = vmax.f32 %v1582_v31, 0.0  ;;  %v2707_v31 = vld [vmem:[%s3774_s9 + $0x60] sm:$0xff] }
 0x1b5   : > { %1624 = vmatmul.bf16.vlgmr.msrb.gmra.mxu2 %v3078_v5  ;;  %v2709_v5 = vld [vmem:[%s3774_s9 + $0x70] sm:$0xff] }
 0x1b6   : > { %v1534_v30 = vpop.f32.mrf.mxu0  ;;  %1944 = vmatpush.bf16.msrb.mxu1 %v2709_v5 }
 0x1b7   : > { %v1583_v9 = vpop.f32.mrf.mxu1  ;;  %v1535_v32 = vadd.f32 %v1534_v30, %v3509_v51 }
 0x1b8   : > { %v1231_v34 = vpop.f32.mrf.mxu2 }
 0x1b9   : > { %v1232_v35 = vadd.f32 %v3522_v14, %v1231_v34  ;;  %v1584_v6 = vadd.f32 %v1583_v9, %v1535_v32 }
 0x1ba   : > { %v1282_v37 = vpop.f32.mrf.mxu3  ;;  %1945 = vmatpush.bf16.msrb.mxu1 %v2708_v4 }
 0x1bb   : > { %v3526_v36 = vadd.f32 %v1280_v29, %v1232_v35  ;;  %v1720_v41 = vmax.f32 %v1584_v6, 0.0 }
 0x1bd   : > { %v1748_v42 = vpack.c.bf16 %v1720_v41, %v1718_v40 }
 0x1be   : > { %v1537_v45 = vpop.f32.mrf.mxu0  ;;  %1946 = vmatpush.bf16.msrb.mxu1 %v2707_v31 }
 0x1bf   : > { %v1586_v46 = vpop.f32.mrf.mxu1  ;;  %1678 = vmatmul.bf16.gmra.mxu3 %v3098_v23  ;;  %1907 = vmatmul.bf16.gmra.mxu0 %v1748_v42  ;;  %v1538_v50 = vadd.f32 %v1537_v45, %v3509_v51 }
 0x1c0   : > { %v1233_v18 = vpop.f32.mrf.mxu2 }
 0x1c1   : > { %v1234_v47 = vadd.f32 %v3522_v14, %v1233_v18  ;;  %v1587_v54 = vadd.f32 %v1586_v46, %v1538_v50 }
 0x1c2   : > { %v1285_v49 = vpop.f32.mrf.mxu3 }
 0x1c3   : > { %v3533_v48 = vadd.f32 %v1282_v37, %v1234_v47  ;;  %v1722_v2 = vmax.f32 %v1587_v54, 0.0  ;;  %v2706_v54 = vld [vmem:[%s3774_s9 + $0x58] sm:$0xff] }
 0x1c4   : > { %1947 = vmatpush.bf16.msrb.mxu1 %v2706_v54 }
 0x1c5   : > { %1629 = vmatmul.bf16.gmra.mxu2 %v3096_v22 }
 0x1c6   : > { %v1539_v52 = vpop.f32.mrf.mxu0 }
 0x1c7   : > { %v1588_v53 = vpop.f32.mrf.mxu1  ;;  %v1540_v26 = vadd.f32 %v1539_v52, %v3509_v51 }
 0x1c8   : > { %v1236_v62 = vpop.f32.mrf.mxu2 }
 0x1c9   : > { %v1237_v56 = vadd.f32 %v3522_v14, %v1236_v62  ;;  %v1589_v23 = vadd.f32 %v1588_v53, %v1540_v26 }
 0x1ca   : > { %v1287_v1 = vpop.f32.mrf.mxu3 }
 0x1cb   : > { %v3539_v33 = vadd.f32 %v1285_v49, %v1237_v56  ;;  %v1724_v10 = vmax.f32 %v1589_v23, 0.0 }
 0x1cd   : > { %v1750_v3 = vpack.c.bf16 %v1724_v10, %v1722_v2 }
 0x1ce   : > { %v1542_v22 = vpop.f32.mrf.mxu0 }
 0x1cf   : > { %v1591_v7 = vpop.f32.mrf.mxu1  ;;  %1683 = vmatmul.bf16.gmra.mxu3 %v3116_v39  ;;  %1912 = vmatmul.bf16.gmra.mxu0 %v1750_v3  ;;  %v1543_v19 = vadd.f32 %v1542_v22, %v3509_v51 }
 0x1d0   : > { %v1238_v17 = vpop.f32.mrf.mxu2 }
 0x1d1   : > { %v1239_v11 = vadd.f32 %v3522_v14, %v1238_v17  ;;  %v1592_v61 = vadd.f32 %v1591_v7, %v1543_v19 }
 0x1d2   : > { %v1290_v16 = vpop.f32.mrf.mxu3 }
 0x1d3   : > { %v3546_v12 = vadd.f32 %v1287_v1, %v1239_v11  ;;  %v1726_v25 = vmax.f32 %v1592_v61, 0.0  ;;  %v2705_v61 = vld [vmem:[%s3774_s9 + $0x50] sm:$0xff] }
 0x1d4   : > { %1948 = vmatpush.bf16.msrb.mxu1 %v2705_v61 }
 0x1d5   : > { %1634 = vmatmul.bf16.gmra.mxu2 %v3114_v38 }
 0x1d6   : > { %v1544_v20 = vpop.f32.mrf.mxu0 }
 0x1d7   : > { %v1593_v21 = vpop.f32.mrf.mxu1  ;;  %v1545_v24 = vadd.f32 %v1544_v20, %v3509_v51 }
 0x1d8   : > { %v1241_v27 = vpop.f32.mrf.mxu2 }
 0x1d9   : > { %v1242_v39 = vadd.f32 %v3522_v14, %v1241_v27  ;;  %v1594_v28 = vadd.f32 %v1593_v21, %v1545_v24 }
 0x1da   : > { %v1292_v29 = vpop.f32.mrf.mxu3 }
 0x1db   : > { %v3552_v8 = vadd.f32 %v1290_v16, %v1242_v39  ;;  %v1728_v30 = vmax.f32 %v1594_v28, 0.0 }
 0x1dd   : > { %v1752_v9 = vpack.c.bf16 %v1728_v30, %v1726_v25 }
 0x1de   : > { %v1547_v38 = vpop.f32.mrf.mxu0 }
 0x1df   : > { %v1596_v32 = vpop.f32.mrf.mxu1  ;;  %1688 = vmatmul.bf16.gmra.mxu3 %v3134_v58  ;;  %1917 = vmatmul.bf16.gmra.mxu0 %v1752_v9  ;;  %v1548_v40 = vadd.f32 %v1547_v38, %v3509_v51 }
 0x1e0   : > { %v1243_v34 = vpop.f32.mrf.mxu2 }
 0x1e1   : > { %v1244_v35 = vadd.f32 %v3522_v14, %v1243_v34  ;;  %v1597_v42 = vadd.f32 %v1596_v32, %v1548_v40  ;;  %v2704_v40 = vld [vmem:[%s3774_s9 + $0x48] sm:$0xff] }
 0x1e2   : > { %v1295_v37 = vpop.f32.mrf.mxu3  ;;  %1949 = vmatpush.bf16.msrb.mxu1 %v2704_v40 }
 0x1e3   : > { %v3559_v6 = vadd.f32 %v1292_v29, %v1244_v35  ;;  %v1730_v50 = vmax.f32 %v1597_v42, 0.0 }
 0x1e5   : > { %1639 = vmatmul.bf16.gmra.mxu2 %v3132_v57 }
 0x1e6   : > { %v1549_v41 = vpop.f32.mrf.mxu0 }
 0x1e7   : > { %v1598_v5 = vpop.f32.mrf.mxu1  ;;  %v1550_v45 = vadd.f32 %v1549_v41, %v3509_v51 }
 0x1e8   : > { %v1246_v46 = vpop.f32.mrf.mxu2 }
 0x1e9   : > { %v1247_v58 = vadd.f32 %v3522_v14, %v1246_v46  ;;  %v1599_v18 = vadd.f32 %v1598_v5, %v1550_v45 }
 0x1ea   : > { %v1297_v49 = vpop.f32.mrf.mxu3 }
 0x1eb   : > { %v3565_v47 = vadd.f32 %v1295_v37, %v1247_v58  ;;  %v1732_v52 = vmax.f32 %v1599_v18, 0.0 }
 0x1ed   : > { %v1754_v53 = vpack.c.bf16 %v1732_v52, %v1730_v50 }
 0x1ee   : > { %v1552_v57 = vpop.f32.mrf.mxu0 }
 0x1ef   : > { %v1601_v26 = vpop.f32.mrf.mxu1  ;;  %1693 = vmatmul.bf16.gmra.mxu3 %v3150_v13  ;;  %1922 = vmatmul.bf16.gmra.mxu0 %v1754_v53  ;;  %v1553_v2 = vadd.f32 %v1552_v57, %v3509_v51 }
 0x1f0   : > { %v1248_v62 = vpop.f32.mrf.mxu2 }
 0x1f1   : > { %v1249_v56 = vadd.f32 %v3522_v14, %v1248_v62  ;;  %v1602_v4 = vadd.f32 %v1601_v26, %v1553_v2 }
 0x1f2   : > { %v1300_v1 = vpop.f32.mrf.mxu3 }
 0x1f3   : > { %v3572_v23 = vadd.f32 %v1297_v49, %v1249_v56  ;;  %v1734_v19 = vmax.f32 %v1602_v4, 0.0 }
 0x1f5   : > { %1644 = vmatmul.bf16.gmra.mxu2 %v3152_v15 }
 0x1f6   : > { %v1554_v10 = vpop.f32.mrf.mxu0 }
 0x1f7   : > { %v1603_v3 = vpop.f32.mrf.mxu1  ;;  %v1555_v22 = vadd.f32 %v1554_v10, %v3509_v51 }
 0x1f8   : > { %v1251_v7 = vpop.f32.mrf.mxu2 }
 0x1f9   : > { %v1252_v13 = vadd.f32 %v3522_v14, %v1251_v7  ;;  %v1604_v17 = vadd.f32 %v1603_v3, %v1555_v22 }
 0x1fa   : > { %v1302_v16 = vpop.f32.mrf.mxu3 }
 0x1fb   : > { %v3578_v11 = vadd.f32 %v1300_v1, %v1252_v13  ;;  %v1736_v20 = vmax.f32 %v1604_v17, 0.0 }
 0x1fd   : > { %v1756_v21 = vpack.c.bf16 %v1736_v20, %v1734_v19 }
 0x1fe   : > { %v1557_v15 = vpop.f32.mrf.mxu0 }
 0x1ff   : > { %v1606_v24 = vpop.f32.mrf.mxu1  ;;  %1698 = vmatmul.bf16.gmra.mxu3 %v3218_v60  ;;  %1927 = vmatmul.bf16.gmra.mxu0 %v1756_v21  ;;  %v1558_v25 = vadd.f32 %v1557_v15, %v3509_v51 }
 0x200   : > { %v1253_v27 = vpop.f32.mrf.mxu2 }
 0x201   : > { %v1254_v39 = vadd.f32 %v3522_v14, %v1253_v27  ;;  %v1607_v9 = vadd.f32 %v1606_v24, %v1558_v25 }
 0x202   : > { %v1305_v29 = vpop.f32.mrf.mxu3 }
 0x203   : > { %v3585_v28 = vadd.f32 %v1302_v16, %v1254_v39  ;;  %v1738_v41 = vmax.f32 %v1607_v9, 0.0 }
 0x205   : > { %1649 = vmatmul.bf16.gmra.mxu2 %v3216_v59 }
 0x206   : > { %v1559_v30 = vpop.f32.mrf.mxu0 }
 0x207   : > { %v1560_v31 = vadd.f32 %v1559_v30, %v3509_v51  ;;  %v1608_v32 = vpop.f32.mrf.mxu1 }
 0x208   : > { %v1256_v38 = vpop.f32.mrf.mxu2 }
 0x209   : > { %v1257_v60 = vadd.f32 %v3522_v14, %v1256_v38  ;;  %v1609_v34 = vadd.f32 %v1608_v32, %v1560_v31 }
 0x20a   : > { %v1307_v37 = vpop.f32.mrf.mxu3 }
 0x20b   : > { %v3591_v35 = vadd.f32 %v1305_v29, %v1257_v60  ;;  %v1740_v5 = vmax.f32 %v1609_v34, 0.0 }
 0x20d   : > { %v1758_v59 = vpack.c.bf16 %v1740_v5, %v1738_v41 }
 0x20e   : > { %v1562_v50 = vpop.f32.mrf.mxu0 }
 0x20f   : > { %1703 = vmatmul.bf16.gmra.mxu3 %v3284_v44  ;;  %1932 = vmatmul.bf16.gmra.mxu0 %v1758_v59  ;;  %v2703_v44 = vld [vmem:[%s3774_s9 + $0x40] sm:$0xff]  ;;  %v1611_v54 = vpop.f32.mrf.mxu1  ;;  %v1563_v10 = vadd.f32 %v1562_v50, %v3509_v51 }
 0x210   : > { %v1258_v42 = vpop.f32.mrf.mxu2  ;;  %1950 = vmatpush.bf16.msrb.mxu1 %v2703_v44 }
 0x211   : > { %v1259_v45 = vadd.f32 %v3522_v14, %v1258_v42  ;;  %v1612_v13 = vadd.f32 %v1611_v54, %v1563_v10 }
 0x212   : > { %v1310_v58 = vpop.f32.mrf.mxu3 }
 0x213   : > { %v3598_v46 = vadd.f32 %v1307_v37, %v1259_v45  ;;  %v1742_v19 = vmax.f32 %v1612_v13, 0.0 }
 0x215   : > { %1654 = vmatmul.bf16.gmra.mxu2 %v3282_v43 }
 0x216   : > { %v1564_v56 = vpop.f32.mrf.mxu0 }
 0x217   : > { %v1565_v1 = vadd.f32 %v1564_v56, %v3509_v51  ;;  %v1613_v4 = vpop.f32.mrf.mxu1  ;;  %v3621_v51 = vperm.slane %v3505_v55, 1 }
 0x218   : > { %v1261_v18 = vpop.f32.mrf.mxu2 }
 0x219   : > { %v1262_v49 = vadd.f32 %v3522_v14, %v1261_v18  ;;  %v1614_v22 = vadd.f32 %v1613_v4, %v1565_v1 }
 0x21a   : > { %v1312_v53 = vpop.f32.mrf.mxu3 }
 0x21b   : > { %v3602_v52 = vadd.f32 %v1310_v58, %v1262_v49  ;;  %v1744_v17 = vmax.f32 %v1614_v22, 0.0 }
 0x21d   : > { %v1760_v21 = vpack.c.bf16 %v1744_v17, %v1742_v19 }
 0x21f   : > { %1708 = vmatmul.bf16.gmra.mxu3 %v3302_v0 }
 0x220   : > { %v1263_v57 = vpop.f32.mrf.mxu2 }
 0x221   : > { %v1264_v26 = vadd.f32 %v3522_v14, %v1263_v57 }
 0x222   : > { %v1315_v43 = vpop.f32.mrf.mxu3 }
 0x223   : > { %v3609_v62 = vadd.f32 %v1312_v53, %v1264_v26 }
 0x225   : > { %1659 = vmatmul.bf16.gmra.mxu2 %v3300_v63 }
 0x228   : > { %v1266_v2 = vpop.f32.mrf.mxu2 }
 0x229   : > { %v1267_v3 = vadd.f32 %v3522_v14, %v1266_v2 }
 0x22a   : > { %v1317_v0 = vpop.f32.mrf.mxu3 }
 0x22b   : > { %v3615_v7 = vadd.f32 %v1315_v43, %v1267_v3 }
 0x230   : > { %v1268_v16 = vpop.f32.mrf.mxu2 }
 0x231   : > { %v1269_v20 = vadd.f32 %v3522_v14, %v1268_v16 }
 0x232   : > { %v1674_v61 = vpop.f32.mrf.mxu3 }
 0x233   : > { %v3618_v63 = vadd.f32 %v1317_v0, %v1269_v20 }
 0x235   : > { %1937 = vmatmul.bf16.vlgmr.msra.gmra.mxu2 %v1760_v21 }
 0x238   : > { %v1625_v15 = vpop.f32.mrf.mxu2 }
 0x239   : > { %v1626_v27 = vadd.f32 %v1625_v15, %v3621_v51 }
 0x23a   : > { %v1676_v24 = vpop.f32.mrf.mxu3 }
 0x23b   : > { %v1675_v29 = vadd.f32 %v1674_v61, %v1626_v27 }
 0x23d   : > { %v1715_v31 = vmax.f32 %v1675_v29, 0.0 }
 0x240   : > { %v1627_v39 = vpop.f32.mrf.mxu2 }
 0x241   : > { %v1628_v25 = vadd.f32 %v1627_v39, %v3621_v51 }
 0x242   : > { %v1679_v9 = vpop.f32.mrf.mxu3 }
 0x243   : > { %v1677_v30 = vadd.f32 %v1676_v24, %v1628_v25 }
 0x245   : > { %v1717_v14 = vmax.f32 %v1677_v30, 0.0 }
 0x247   : > { %v1747_v38 = vpack.c.bf16 %v1717_v14, %v1715_v31 }
 0x248   : > { %v1630_v32 = vpop.f32.mrf.mxu2 }
 0x249   : > { %1951 = vmatmul.bf16.vlgmr.msrb.gmra.mxu1 %v1747_v38  ;;  %v1631_v34 = vadd.f32 %v1630_v32, %v3621_v51 }
 0x24a   : > { %v1681_v60 = vpop.f32.mrf.mxu3 }
 0x24b   : > { %v1680_v55 = vadd.f32 %v1679_v9, %v1631_v34 }
 0x24d   : > { %v1719_v59 = vmax.f32 %v1680_v55, 0.0 }
 0x250   : > { %v1632_v37 = vpop.f32.mrf.mxu2 }
 0x251   : > { %v1633_v40 = vadd.f32 %v1632_v37, %v3621_v51 }
 0x252   : > { %v1684_v5 = vpop.f32.mrf.mxu3 }
 0x253   : > { %v1682_v41 = vadd.f32 %v1681_v60, %v1633_v40 }
 0x255   : > { %v1721_v42 = vmax.f32 %v1682_v41, 0.0 }
 0x257   : > { %v1749_v45 = vpack.c.bf16 %v1721_v42, %v1719_v59 }
 0x258   : > { %v1635_v58 = vpop.f32.mrf.mxu2 }
 0x259   : > { %1956 = vmatmul.bf16.gmra.mxu1 %v1749_v45  ;;  %v1636_v49 = vadd.f32 %v1635_v58, %v3621_v51 }
 0x25a   : > { %v1686_v18 = vpop.f32.mrf.mxu3 }
 0x25b   : > { %v1685_v53 = vadd.f32 %v1684_v5, %v1636_v49 }
 0x25d   : > { %v1723_v26 = vmax.f32 %v1685_v53, 0.0 }
 0x260   : > { %v1637_v50 = vpop.f32.mrf.mxu2 }
 0x261   : > { %v1638_v44 = vadd.f32 %v1637_v50, %v3621_v51 }
 0x262   : > { %v1689_v57 = vpop.f32.mrf.mxu3 }
 0x263   : > { %v1687_v54 = vadd.f32 %v1686_v18, %v1638_v44 }
 0x265   : > { %v1725_v43 = vmax.f32 %v1687_v54, 0.0  ;;  %v1903_v54 = vpop.f32.mrf.mxu0 }
 0x267   : > { %v1751_v56 = vpack.c.bf16 %v1725_v43, %v1723_v26 }
 0x268   : > { %v1640_v1 = vpop.f32.mrf.mxu2 }
 0x269   : > { %1961 = vmatmul.bf16.gmra.mxu1 %v1751_v56  ;;  %v1641_v10 = vadd.f32 %v1640_v1, %v3621_v51 }
 0x26a   : > { %v1691_v2 = vpop.f32.mrf.mxu3 }
 0x26b   : > { %v1690_v4 = vadd.f32 %v1689_v57, %v1641_v10 }
 0x26d   : > { %v1727_v17 = vmax.f32 %v1690_v4, 0.0 }
 0x270   : > { %v1642_v3 = vpop.f32.mrf.mxu2 }
 0x271   : > { %v1643_v22 = vadd.f32 %v1642_v3, %v3621_v51  ;;  %v1905_v3 = vpop.f32.mrf.mxu0 }
 0x272   : > { %v1694_v13 = vpop.f32.mrf.mxu3 }
 0x273   : > { %v1692_v0 = vadd.f32 %v1691_v2, %v1643_v22 }
 0x275   : > { %v1729_v16 = vmax.f32 %v1692_v0, 0.0 }
 0x277   : > { %v1753_v19 = vpack.c.bf16 %v1729_v16, %v1727_v17 }
 0x278   : > { %v1645_v20 = vpop.f32.mrf.mxu2 }
 0x279   : > { %1966 = vmatmul.bf16.gmra.mxu1 %v1753_v19  ;;  %v1646_v61 = vadd.f32 %v1645_v20, %v3621_v51  ;;  %v1908_v16 = vpop.f32.mrf.mxu0  ;;  %v3642_v19 = vld [vmem:[%s3775_s10] ss:$0 sm:$0xff] }
 0x27a   : > { %v1696_v21 = vpop.f32.mrf.mxu3  ;;  %v1904_v20 = vadd.f32 %v3642_v19, %v1903_v54 }
 0x27b   : > { %v1695_v24 = vadd.f32 %v1694_v13, %v1646_v61 }
 0x27d   : > { %v1731_v25 = vmax.f32 %v1695_v24, 0.0 }
 0x280   : > { %v1647_v15 = vpop.f32.mrf.mxu2 }
 0x281   : > { %v1648_v27 = vadd.f32 %v1647_v15, %v3621_v51 }
 0x282   : > { %v1699_v29 = vpop.f32.mrf.mxu3 }
 0x283   : > { %v1697_v39 = vadd.f32 %v1696_v21, %v1648_v27  ;;  %v1910_v21 = vpop.f32.mrf.mxu0 }
 0x285   : > { %v1733_v30 = vmax.f32 %v1697_v39, 0.0 }
 0x287   : > { %v1755_v9 = vpack.c.bf16 %v1733_v30, %v1731_v25 }
 0x288   : > { %v1650_v31 = vpop.f32.mrf.mxu2 }
 0x289   : > { %1971 = vmatmul.bf16.gmra.mxu1 %v1755_v9  ;;  %v1651_v38 = vadd.f32 %v1650_v31, %v3621_v51  ;;  %v1911_v31 = vadd.f32 %v3642_v19, %v1910_v21 }
 0x28a   : > { %v1701_v14 = vpop.f32.mrf.mxu3 }
 0x28b   : > { %v1700_v60 = vadd.f32 %v1699_v29, %v1651_v38  ;;  %v1913_v39 = vpop.f32.mrf.mxu0  ;;  %v1909_v29 = vadd.f32 %v3642_v19, %v1908_v16 }
 0x28d   : > { %v1735_v40 = vmax.f32 %v1700_v60, 0.0  ;;  %v1914_v60 = vadd.f32 %v3642_v19, %v1913_v39 }
 0x290   : > { %v1652_v32 = vpop.f32.mrf.mxu2 }
 0x291   : > { %v1653_v34 = vadd.f32 %v1652_v32, %v3621_v51 }
 0x292   : > { %v1704_v55 = vpop.f32.mrf.mxu3 }
 0x293   : > { %v1702_v37 = vadd.f32 %v1701_v14, %v1653_v34  ;;  %v1915_v9 = vpop.f32.mrf.mxu0 }
 0x295   : > { %v1737_v41 = vmax.f32 %v1702_v37, 0.0 }
 0x297   : > { %v1757_v5 = vpack.c.bf16 %v1737_v41, %v1735_v40 }
 0x298   : > { %v1655_v59 = vpop.f32.mrf.mxu2 }
 0x299   : > { %1976 = vmatmul.bf16.gmra.mxu1 %v1757_v5  ;;  %v1656_v42 = vadd.f32 %v1655_v59, %v3621_v51 }
 0x29a   : > { %v1706_v45 = vpop.f32.mrf.mxu3 }
 0x29b   : > { %v1705_v18 = vadd.f32 %v1704_v55, %v1656_v42  ;;  %v1918_v32 = vpop.f32.mrf.mxu0  ;;  %v1916_v55 = vadd.f32 %v3642_v19, %v1915_v9 }
 0x29c   : > { %v1919_v59 = vadd.f32 %v3642_v19, %v1918_v32 }
 0x29d   : > { %v1739_v53 = vmax.f32 %v1705_v18, 0.0 }
 0x2a0   : > { %v1657_v58 = vpop.f32.mrf.mxu2 }
 0x2a1   : > { %v1658_v49 = vadd.f32 %v1657_v58, %v3621_v51 }
 0x2a2   : > { %v1709_v26 = vpop.f32.mrf.mxu3 }
 0x2a3   : > { %v1707_v50 = vadd.f32 %v1706_v45, %v1658_v49  ;;  %v1920_v40 = vpop.f32.mrf.mxu0 }
 0x2a4   : > { %v1921_v18 = vadd.f32 %v3642_v19, %v1920_v40 }
 0x2a5   : > { %v1741_v44 = vmax.f32 %v1707_v50, 0.0 }
 0x2a7   : > { %v1759_v57 = vpack.c.bf16 %v1741_v44, %v1739_v53 }
 0x2a8   : > { %v1660_v43 = vpop.f32.mrf.mxu2 }
 0x2a9   : > { %1981 = vmatmul.bf16.gmra.mxu1 %v1759_v57  ;;  %v1661_v56 = vadd.f32 %v1660_v43, %v3621_v51 }
 0x2aa   : > { %v1711_v4 = vpop.f32.mrf.mxu3 }
 0x2ab   : > { %v1710_v2 = vadd.f32 %v1709_v26, %v1661_v56  ;;  %v1923_v58 = vpop.f32.mrf.mxu0 }
 0x2ac   : > { %v1924_v44 = vadd.f32 %v3642_v19, %v1923_v58 }
 0x2ad   : > { %v1743_v0 = vmax.f32 %v1710_v2, 0.0 }
 0x2b0   : > { %v1662_v1 = vpop.f32.mrf.mxu2 }
 0x2b1   : > { %v1663_v10 = vadd.f32 %v1662_v1, %v3621_v51  ;;  %v1906_v51 = vadd.f32 %v3642_v19, %v1905_v3 }
 0x2b3   : > { %v1712_v22 = vadd.f32 %v1711_v4, %v1663_v10  ;;  %v1925_v53 = vpop.f32.mrf.mxu0 }
 0x2b4   : > { %v1926_v43 = vadd.f32 %v3642_v19, %v1925_v53 }
 0x2b5   : > { %v1745_v13 = vmax.f32 %v1712_v22, 0.0 }
 0x2b7   : > { %v1761_v17 = vpack.c.bf16 %v1745_v13, %v1743_v0 }
 0x2b9   : > { %1986 = vmatmul.bf16.gmra.mxu1 %v1761_v17 }
 0x2bb   : > { %v1928_v26 = vpop.f32.mrf.mxu0 }
 0x2bc   : > { %v1929_v2 = vadd.f32 %v3642_v19, %v1928_v26 }
 0x2c3   : > { %v1930_v10 = vpop.f32.mrf.mxu0 }
 0x2c4   : > { %v1931_v22 = vadd.f32 %v3642_v19, %v1930_v10 }
 0x2c6   : > { %v1952_v61 = vpop.f32.mrf.mxu1 }
 0x2c7   : > { %v3645_v15 = vadd.f32 %v1952_v61, %v1904_v20 }
 0x2c9   : > { %1992 = vadd.xlane.f32.xlu0 %v3645_v15 }
 0x2cb   : > { %v1933_v17 = vpop.f32.mrf.mxu0 }
 0x2cc   : > { %v1934_v16 = vadd.f32 %v3642_v19, %v1933_v17 }
 0x2ce   : > { %v1954_v24 = vpop.f32.mrf.mxu1 }
 0x2cf   : > { %v3649_v27 = vadd.f32 %v1954_v24, %v1906_v51 }
 0x2d1   : > { %1994 = vadd.xlane.f32.xlu0 %v3649_v27 }
 0x2d3   : > { %v1935_v61 = vpop.f32.mrf.mxu0 }
 0x2d4   : > { %v1936_v51 = vadd.f32 %v3642_v19, %v1935_v61 }
 0x2d6   : > { %v1957_v25 = vpop.f32.mrf.mxu1 }
 0x2d7   : > { %v3653_v30 = vadd.f32 %v1957_v25, %v1909_v29  ;;  %v1938_v29 = vpop.f32.mrf.mxu2 }
 0x2d8   : > { %v1939_v25 = vadd.f32 %v3642_v19, %v1938_v29 }
 0x2d9   : > { %1996 = vadd.xlane.f32.xlu1 %v3653_v30 }
 0x2de   : > { %v1959_v14 = vpop.f32.mrf.mxu1 }
 0x2df   : > { %v3657_v38 = vadd.f32 %v1959_v14, %v1911_v31  ;;  %v1940_v14 = vpop.f32.mrf.mxu2 }
 0x2e1   : > { %1998 = vadd.xlane.f32.xlu1 %v3657_v38 }
 0x2e6   : > { %v1962_v34 = vpop.f32.mrf.mxu1 }
 0x2e7   : > { %v3661_v37 = vadd.f32 %v1962_v34, %v1914_v60  ;;  %v1941_v60 = vadd.f32 %v3642_v19, %v1940_v14 }
 0x2e9   : > { %2000 = vadd.xlane.f32.xlu2 %v3661_v37 }
 0x2ee   : > { %v1964_v41 = vpop.f32.mrf.mxu1 }
 0x2ef   : > { %v3665_v5 = vadd.f32 %v1964_v41, %v1916_v55 }
 0x2f1   : > { %2002 = vadd.xlane.f32.xlu2 %v3665_v5 }
 0x2f6   : > { %v1967_v42 = vpop.f32.mrf.mxu1 }
 0x2f7   : > { %v3669_v45 = vadd.f32 %v1967_v42, %v1919_v59 }
 0x2f9   : > { %2004 = vadd.xlane.f32.xlu0 %v3669_v45 }
 0x2fe   : > { %v1969_v49 = vpop.f32.mrf.mxu1 }
 0x2ff   : > { %v3673_v50 = vadd.f32 %v1969_v49, %v1921_v18 }
 0x301   : > { %2006 = vadd.xlane.f32.xlu1 %v3673_v50 }
 0x306   : > { %v1972_v54 = vpop.f32.mrf.mxu1 }
 0x307   : > { %v3677_v57 = vadd.f32 %v1972_v54, %v1924_v44 }
 0x309   : > { %2008 = vadd.xlane.f32.xlu2 %v3677_v57 }
 0x30e   : > { %v1974_v56 = vpop.f32.mrf.mxu1 }
 0x30f   : > { %v3681_v1 = vadd.f32 %v1974_v56, %v1926_v43 }
 0x311   : > { %2010 = vadd.xlane.f32.xlu0 %v3681_v1 }
 0x316   : > { %v1977_v3 = vpop.f32.mrf.mxu1 }
 0x317   : > { %v3685_v4 = vadd.f32 %v1977_v3, %v1929_v2 }
 0x319   : > { %2012 = vadd.xlane.f32.xlu1 %v3685_v4 }
 0x31e   : > { %v1979_v0 = vpop.f32.mrf.mxu1 }
 0x31f   : > { %v3689_v13 = vadd.f32 %v1979_v0, %v1931_v22 }
 0x321   : > { %2014 = vadd.xlane.f32.xlu2 %v3689_v13 }
 0x326   : > { %v1982_v20 = vpop.f32.mrf.mxu1 }
 0x327   : > { %v3693_v21 = vadd.f32 %v1982_v20, %v1934_v16 }
 0x329   : > { %2016 = vadd.xlane.f32.xlu0 %v3693_v21 }
 0x32e   : > { %v1984_v24 = vpop.f32.mrf.mxu1 }
 0x32f   : > { %v3697_v39 = vadd.f32 %v1984_v24, %v1936_v51 }
 0x331   : > { %2018 = vadd.xlane.f32.xlu1 %v3697_v39 }
 0x336   : > { %v1987_v9 = vpop.f32.mrf.mxu1 }
 0x337   : > { %v3701_v31 = vadd.f32 %v1987_v9, %v1939_v25 }
 0x339   : > { %2020 = vadd.xlane.f32.xlu2 %v3701_v31 }
 0x33c   : > { %v1993_v32 = vpop.xlane.xlu0 %1992 }
 0x33d   : > { %v2024_v34 = vmul.f32 0.25, %v1993_v32 }
 0x33e   : > { %v1989_v55 = vpop.f32.mrf.mxu1 }
 0x33f   : > { %v2040_v40 = vsub.f32 %v3645_v15, %v2024_v34  ;;  %v3707_v41 = vadd.f32 %v1989_v55, %v1941_v60 }
 0x341   : > { %v2056_v59 = vadd.f32 %v2040_v40, %v3526_v36  ;;  %2022 = vadd.xlane.f32.xlu0 %v3707_v41 }
 0x343   : > { %2072 = vst [vmem:[%s3712_s21] sm:$0xff] %v2056_v59 }
 0x344   : > { %v1995_v19 = vpop.xlane.xlu0 %1994 }
 0x345   : > { %v2025_v42 = vmul.f32 0.25, %v1995_v19 }
 0x347   : > { %v2041_v15 = vsub.f32 %v3649_v27, %v2025_v42 }
 0x349   : > { %v2057_v58 = vadd.f32 %v2041_v15, %v3533_v48 }
 0x34b   : > { %2073 = vst [vmem:[%s3712_s21 + $0x8] sm:$0xff] %v2057_v58 }
 0x34c   : > { %v1997_v18 = vpop.xlane.xlu1 %1996 }
 0x34d   : > { %v2026_v49 = vmul.f32 0.25, %v1997_v18 }
 0x34f   : > { %v2042_v53 = vsub.f32 %v3653_v30, %v2026_v49 }
 0x351   : > { %v2058_v44 = vadd.f32 %v2042_v53, %v3539_v33 }
 0x353   : > { %2074 = vst [vmem:[%s3712_s21 + $0x10] sm:$0xff] %v2058_v44 }
 0x354   : > { %v1999_v36 = vpop.xlane.xlu1 %1998 }
 0x355   : > { %v2027_v54 = vmul.f32 0.25, %v1999_v36 }
 0x357   : > { %v2043_v26 = vsub.f32 %v3657_v38, %v2027_v54 }
 0x359   : > { %v2059_v43 = vadd.f32 %v2043_v26, %v3546_v12 }
 0x35b   : > { %2075 = vst [vmem:[%s3712_s21 + $0x18] sm:$0xff] %v2059_v43 }
 0x35c   : > { %v2001_v27 = vpop.xlane.xlu2 %2000 }
 0x35d   : > { %v2028_v48 = vmul.f32 0.25, %v2001_v27 }
 0x35f   : > { %v2044_v56 = vsub.f32 %v3661_v37, %v2028_v48 }
 0x361   : > { %v2060_v2 = vadd.f32 %v2044_v56, %v3552_v8 }
 0x363   : > { %2076 = vst [vmem:[%s3712_s21 + $0x20] sm:$0xff] %v2060_v2 }
 0x364   : > { %v2003_v30 = vpop.xlane.xlu2 %2002 }
 0x365   : > { %v2029_v33 = vmul.f32 0.25, %v2003_v30 }
 0x367   : > { %v2045_v10 = vsub.f32 %v3665_v5, %v2029_v33 }
 0x369   : > { %v2061_v3 = vadd.f32 %v2045_v10, %v3559_v6 }
 0x36b   : > { %2077 = vst [vmem:[%s3712_s21 + $0x28] sm:$0xff] %v2061_v3 }
 0x36c   : > { %v2005_v38 = vpop.xlane.xlu0 %2004 }
 0x36d   : > { %v2030_v12 = vmul.f32 0.25, %v2005_v38 }
 0x36f   : > { %v2046_v22 = vsub.f32 %v3669_v45, %v2030_v12 }
 0x371   : > { %v2062_v0 = vadd.f32 %v2046_v22, %v3565_v47 }
 0x373   : > { %2078 = vst [vmem:[%s3712_s21 + $0x30] sm:$0xff] %v2062_v0 }
 0x374   : > { %v2007_v37 = vpop.xlane.xlu1 %2006 }
 0x375   : > { %v2031_v8 = vmul.f32 0.25, %v2007_v37 }
 0x377   : > { %v2047_v17 = vsub.f32 %v3673_v50, %v2031_v8 }
 0x379   : > { %v2063_v16 = vadd.f32 %v2047_v17, %v3572_v23 }
 0x37b   : > { %2079 = vst [vmem:[%s3712_s21 + $0x38] sm:$0xff] %v2063_v16 }
 0x37c   : > { %v2009_v5 = vpop.xlane.xlu2 %2008 }
 0x37d   : > { %v2032_v6 = vmul.f32 0.25, %v2009_v5 }
 0x37f   : > { %v2048_v20 = vsub.f32 %v3677_v57, %v2032_v6 }
 0x381   : > { %v2064_v61 = vadd.f32 %v2048_v20, %v3578_v11 }
 0x383   : > { %2080 = vst [vmem:[%s3712_s21 + $0x40] sm:$0xff] %v2064_v61 }
 0x384   : > { %v2011_v45 = vpop.xlane.xlu0 %2010 }
 0x385   : > { %v2033_v47 = vmul.f32 0.25, %v2011_v45 }
 0x387   : > { %v2049_v51 = vsub.f32 %v3681_v1, %v2033_v47 }
 0x389   : > { %v2065_v24 = vadd.f32 %v2049_v51, %v3585_v28 }
 0x38b   : > { %2081 = vst [vmem:[%s3712_s21 + $0x48] sm:$0xff] %v2065_v24 }
 0x38c   : > { %v2013_v50 = vpop.xlane.xlu1 %2012 }
 0x38d   : > { %v2034_v23 = vmul.f32 0.25, %v2013_v50 }
 0x38f   : > { %v2050_v29 = vsub.f32 %v3685_v4, %v2034_v23 }
 0x391   : > { %v2066_v25 = vadd.f32 %v2050_v29, %v3591_v35 }
 0x393   : > { %2082 = vst [vmem:[%s3712_s21 + $0x50] sm:$0xff] %v2066_v25 }
 0x394   : > { %v2015_v57 = vpop.xlane.xlu2 %2014 }
 0x395   : > { %v2035_v11 = vmul.f32 0.25, %v2015_v57 }
 0x397   : > { %v2051_v9 = vsub.f32 %v3689_v13, %v2035_v11 }
 0x399   : > { %v2067_v14 = vadd.f32 %v2051_v9, %v3598_v46 }
 0x39b   : > { %2083 = vst [vmem:[%s3712_s21 + $0x58] sm:$0xff] %v2067_v14 }
 0x39c   : > { %v2017_v1 = vpop.xlane.xlu0 %2016 }
 0x39d   : > { %v2036_v28 = vmul.f32 0.25, %v2017_v1 }
 0x39f   : > { %v2052_v32 = vsub.f32 %v3693_v21, %v2036_v28 }
 0x3a1   : > { %v2068_v60 = vadd.f32 %v2052_v32, %v3602_v52 }
 0x3a3   : > { %2084 = vst [vmem:[%s3712_s21 + $0x60] sm:$0xff] %v2068_v60 }
 0x3a4   : > { %v2019_v4 = vpop.xlane.xlu1 %2018 }
 0x3a5   : > { %v2037_v35 = vmul.f32 0.25, %v2019_v4 }
 0x3a7   : > { %v2053_v34 = vsub.f32 %v3697_v39, %v2037_v35 }
 0x3a9   : > { %v2069_v55 = vadd.f32 %v2053_v34, %v3609_v62 }
 0x3ab   : > { %2085 = vst [vmem:[%s3712_s21 + $0x68] sm:$0xff] %v2069_v55 }
 0x3ac   : > { %v2021_v13 = vpop.xlane.xlu2 %2020 }
 0x3ad   : > { %v2038_v40 = vmul.f32 0.25, %v2021_v13 }
 0x3af   : > { %v2054_v46 = vsub.f32 %v3701_v31, %v2038_v40 }
 0x3b1   : > { %v2070_v59 = vadd.f32 %v2054_v46, %v3615_v7 }
 0x3b3   : > { %2086 = vst [vmem:[%s3712_s21 + $0x70] sm:$0xff] %v2070_v59 }
 0x3b4   : > { %v2023_v19 = vpop.xlane.xlu0 %2022 }
 0x3b5   : > { %v2039_v21 = vmul.f32 0.25, %v2023_v19 }
 0x3b7   : > { %v2055_v52 = vsub.f32 %v3707_v41, %v2039_v21 }
 0x3b9   : > { %v2071_v42 = vadd.f32 %v2055_v52, %v3618_v63 }
 0x3bb   : > { %2087 = vst [vmem:[%s3712_s21 + $0x78] sm:$0xff] %v2071_v42 }
 0x3bc PF: > { %s21_s17 = sadd.s32 1, %s2739_s17  }
 0x3bd   : > { %p18_p4 = scmp.ge.s32.totalorder %s21_s17, 4  }
 0x3bf   :  { %20 = sbr.rel (!%p18_p4) target bundleno = 1 (0x1), region = 94 }

</bundles_post_ra>
